<compile_context>
chip_gen: v7x
topology: tpu7x:2x2x1
jax: 0.10.0
libtpu: 0.0.40
codegen_flags: <defaults>
</compile_context>

<pallas_src>
import numpy as np
import jax
import jax.numpy as jnp
from jax import lax
from jax.experimental import pallas as pl
from jax.experimental.pallas import tpu as pltpu


def _make_asm_kernel(n, bt, per_slice_final, use_karatsuba):
    """Kernel: E_b = conj(Ac^T) @ (H * (Ac @ X_b @ Ac^T)) @ conj(Ac)."""

    def kernel(xr_ref, xi_ref,
               acr_ref, aci_ref,          # Ac      (Np', N)    bf16
               atr_ref, ati_ref,          # Ac^T    (N, Np')    bf16
               hr_ref, hi_ref,            # H       (Np', Np')  f32 (VPU only)
               er_ref, ei_ref,            # out     (bt*N, N)   f32
               ysr, ysi):                 # scratch (bt*N, Np') bf16 (Y then U)

        acr = acr_ref[...]
        aci = aci_ref[...]
        atr = atr_ref[...]
        ati = ati_ref[...]
        ati_neg = -ati                     # conj(Ac^T) imag, hoisted
        aci_neg = -aci                     # conj(Ac)   imag, hoisted

        if use_karatsuba:
            # Constant Karatsuba sum/diff planes, computed once per grid step.
            ac_sum = acr + aci             # Ac as LHS
            at_sum = atr + ati             # Ac^T as RHS
            atc_sum = atr - ati            # conj(Ac^T) as LHS
            acc_sum = acr - aci            # conj(Ac) as RHS
        else:
            ac_sum = at_sum = atc_sum = acc_sum = None

        def cmm(pr, pi, qr, qi, ps=None, qs=None):
            """Complex matmul: bf16 MXU operands, f32 accumulation."""
            if use_karatsuba:
                # 3 real matmuls; sums taken BEFORE the bf16 cast (accuracy).
                if ps is None:
                    ps = pr + pi
                if qs is None:
                    qs = qr + qi
                pr = pr.astype(jnp.bfloat16); pi = pi.astype(jnp.bfloat16)
                qr = qr.astype(jnp.bfloat16); qi = qi.astype(jnp.bfloat16)
                ps = ps.astype(jnp.bfloat16); qs = qs.astype(jnp.bfloat16)
                m1 = jnp.dot(pr, qr, preferred_element_type=jnp.float32)
                m2 = jnp.dot(pi, qi, preferred_element_type=jnp.float32)
                m3 = jnp.dot(ps, qs, preferred_element_type=jnp.float32)
                return m1 - m2, m3 - m1 - m2
            # Plain 4-matmul form (v6e/v7x: MXU headroom, save the VALU adds).
            pr = pr.astype(jnp.bfloat16); pi = pi.astype(jnp.bfloat16)
            qr = qr.astype(jnp.bfloat16); qi = qi.astype(jnp.bfloat16)
            rr = jnp.dot(pr, qr, preferred_element_type=jnp.float32)
            ii = jnp.dot(pi, qi, preferred_element_type=jnp.float32)
            ri = jnp.dot(pr, qi, preferred_element_type=jnp.float32)
            ir = jnp.dot(pi, qr, preferred_element_type=jnp.float32)
            return rr - ii, ri + ir

        # ---- step 1 (row-stacked over bt slices): Y = X @ Ac^T -> (bt*N, Np')
        yr, yi = cmm(xr_ref[...], xi_ref[...], atr, ati, qs=at_sum)
        ysr[...] = yr.astype(jnp.bfloat16)
        ysi[...] = yi.astype(jnp.bfloat16)

        def slice_body(b, carry):
            row = b * n
            if not isinstance(row, int):
                row = pl.multiple_of(row, n)
            ybr = ysr[pl.ds(row, n), :]
            ybi = ysi[pl.ds(row, n), :]
            # F_b = Ac @ Y_b = Ac @ X_b @ Ac^T                   -> (Np', Np')
            fr, fi = cmm(acr, aci, ybr, ybi, ps=ac_sum)
            # G_b = H * F_b  (elementwise complex, f32, VPU; H read from ref)
            hr = hr_ref[...]
            hi = hi_ref[...]
            gr = fr * hr - fi * hi
            gi = fr * hi + fi * hr
            # U_b = conj(Ac^T) @ G_b                             -> (N, Np')
            ur, ui = cmm(atr, ati_neg, gr, gi, ps=atc_sum)
            if per_slice_final:
                # E_b = U_b @ conj(Ac); write straight to the output block.
                ebr, ebi = cmm(ur, ui, acr, aci_neg, qs=acc_sum)
                er_ref[pl.ds(row, n), :] = ebr
                ei_ref[pl.ds(row, n), :] = ebi
            else:
                # Y rows of this slice are consumed; reuse them for U (bf16).
                ysr[pl.ds(row, n), :] = ur.astype(jnp.bfloat16)
                ysi[pl.ds(row, n), :] = ui.astype(jnp.bfloat16)
            return carry

        if bt == 1:
            slice_body(0, 0)
        else:
            lax.fori_loop(0, bt, slice_body, 0)

        if not per_slice_final:
            # ---- step 4 (row-stacked): E = U @ conj(Ac)        -> (bt*N, N)
            er, ei = cmm(ysr[...], ysi[...], acr, aci_neg, qs=acc_sum)
            er_ref[...] = er
            ei_ref[...] = ei

    return kernel


class ASMPropPallas:
    """JAX / Pallas TPU port of the PyTorch ASM_Prop module."""

    def __init__(self, wavelength, dx, distance, N, padding=0.5):
        self.wavelength = float(wavelength)
        self.dx = float(dx)
        self.distance = float(distance)
        self.padding = float(padding)
        self.N = int(N)

        Np = int((1 + 2 * self.padding) * self.N)
        c = int(self.padding * self.N)
        if Np != self.N + 2 * c:
            raise ValueError("padding/N combination is inconsistent "
                             "(it would also break the torch module)")
        self.Np = Np
        self.crop = c
        # Lane-dense padded transform size (zero rows of Ac / zero H entries
        # are exact no-ops in the algebra, but make all Np-tiles 128-aligned).
        self.Npad = max(128, -(-Np // 128) * 128)

        # ---- hardware probe (generation-aware tiling / cmm variant) ----
        kind = ""
        try:
            kind = jax.devices()[0].device_kind.lower()
        except Exception:
            pass
        self._is_v5e = ("v5 lite" in kind) or ("v5e" in kind)
        self._is_v7 = "v7" in kind
        try:
            self._vmem_phys = int(pltpu.get_tpu_info().vmem_capacity_bytes)
        except Exception:
            self._vmem_phys = (64 << 20) if self._is_v7 else (128 << 20)
        self._use_karatsuba = self._is_v5e          # MXU-bound chip only
        self._per_slice_final = self.N >= 256       # one slice fills the MXU

        # ---- band-limited ASM transfer function H (same math as torch) ----
        k = 2.0 * np.pi / self.wavelength
        kx_max = 0.5 / abs(self.dx)
        kx = 2.0 * np.pi * np.linspace(-kx_max, kx_max, Np)
        Kx, Ky = np.meshgrid(kx, kx, indexing="ij")        # torch.meshgrid 'ij'
        arg = k ** 2 - Kx ** 2 - Ky ** 2
        ang = self.distance * np.sqrt(np.maximum(arg, 0.0))
        valid = (Kx ** 2 + Ky ** 2) <= k ** 2
        Hr = np.where(valid, np.cos(ang), 0.0)
        Hi = np.where(valid, np.sin(ang), 0.0)
        self._h_np = (Hr + 1j * Hi).astype(np.complex64)   # jnp.fft reference

        # ---- centered ortho DFT matrix A (A = A^T, ift2-matrix = conj(A));
        #      only the cropped column band Ac is shipped, zero-padded to Npad.
        I = np.eye(Np)
        A = np.fft.fftshift(
            np.fft.fft(np.fft.ifftshift(I, axes=0), axis=0, norm="ortho"),
            axes=0)
        Ac = np.zeros((self.Npad, self.N), dtype=np.complex128)
        Ac[:Np, :] = A[:, c:c + self.N]
        Hp_r = np.zeros((self.Npad, self.Npad), dtype=np.float64)
        Hp_i = np.zeros((self.Npad, self.Npad), dtype=np.float64)
        Hp_r[:Np, :Np] = Hr
        Hp_i[:Np, :Np] = Hi

        bf16 = lambda a: jnp.asarray(np.ascontiguousarray(a), jnp.bfloat16)
        f32 = lambda a: jnp.asarray(np.ascontiguousarray(a), jnp.float32)
        self.consts = (bf16(Ac.real), bf16(Ac.imag),        # Ac    (Npad, N)
                       bf16(Ac.real.T), bf16(Ac.imag.T),    # Ac^T  (N, Npad)
                       f32(Hp_r), f32(Hp_i))                # H     (Npad, Npad)

    # ----- VMEM budget for one grid step with bt fused slices -----
    def _vmem_bytes(self, bt):
        n, npd = self.N, self.Npad
        rows = bt * n
        const = 4 * npd * n * 2 + 2 * npd * npd * 4         # Ac/Ac^T bf16 + H f32
        io = 2 * 2 * rows * n * 2 + 2 * 2 * rows * n * 4    # in bf16 / out f32, x2 buf
        scr = 2 * rows * npd * 2                            # Y/U bf16 scratch
        step1 = 2 * rows * npd * 4 + 2 * rows * n * 4       # Y f32 + X live
        per_slice = (4 * npd * npd + 4 * n * npd + 2 * n * n) * 4
        return const + io + scr + max(step1, per_slice)

    def _choose_bt(self, bc):
        """Slices fused per grid step: row-stack toward MXU-filling sizes,
        keep >= 2 grid steps when possible, and let the tiling (not just
        vmem_limit_bytes) enforce the per-generation VMEM fit."""
        n = self.N
        divisors = [d for d in range(1, bc + 1) if bc % d == 0]
        # bf16 second-minor blocks want 16-row alignment (or the full array)
        feasible = [d for d in divisors if (d * n) % 16 == 0 or d == bc]
        if not feasible:
            feasible = [bc]
        budget = int(0.70 * self._vmem_phys)
        row_cap = 512 if self._is_v7 else 1024

        def ok(d):
            return (d * n <= row_cap
                    and (bc < 2 or bc // d >= 2)
                    and self._vmem_bytes(d) <= budget)

        good = [d for d in feasible if ok(d)]
        if good:
            return max(good)
        fit = [d for d in feasible if self._vmem_bytes(d) <= budget]
        return min(fit) if fit else min(feasible)

    def __call__(self, field):
        lead = field.shape[:-2]
        nx, ny = int(field.shape[-2]), int(field.shape[-1])
        if nx != self.N or ny != self.N:
            raise ValueError(f"field spatial dims must be ({self.N},{self.N})")
        bc = int(np.prod(lead)) if lead else 1
        N, Npad = self.N, self.Npad

        # row-stacked (bc*N, N) layout so the batch folds into the matmul rows
        xr = jnp.real(field).reshape(bc * N, N).astype(jnp.bfloat16)
        xi = jnp.imag(field).reshape(bc * N, N).astype(jnp.bfloat16)

        bt = self._choose_bt(bc)
        grid = bc // bt
        rows = bt * N

        fld_spec = pl.BlockSpec((rows, N), lambda i: (i, 0))
        # constants: constant index_map + single buffer (no double-buffering)
        ac_spec = pl.BlockSpec((Npad, N), lambda i: (0, 0),
                               pipeline_mode=pl.Buffered(1))
        at_spec = pl.BlockSpec((N, Npad), lambda i: (0, 0),
                               pipeline_mode=pl.Buffered(1))
        h_spec = pl.BlockSpec((Npad, Npad), lambda i: (0, 0),
                              pipeline_mode=pl.Buffered(1))

        needed = self._vmem_bytes(bt)
        vmem_limit = int(min(max(needed + (16 << 20), 32 << 20),
                             int(0.9 * self._vmem_phys)))

        # advisory cost estimate so XLA overlaps the surrounding split/cast ops
        mmf = 6 if self._use_karatsuba else 8
        flops_slice = mmf * (2 * N * N * Npad + 2 * N * Npad * Npad) \
            + 6 * Npad * Npad
        bytes_acc = (2 * bc * N * N * 2 + 2 * bc * N * N * 4
                     + 4 * Npad * N * 2 + 2 * Npad * Npad * 4)
        cost = pl.CostEstimate(flops=int(bc * flops_slice), transcendentals=0,
                               bytes_accessed=int(bytes_acc))

        kernel = _make_asm_kernel(N, bt, self._per_slice_final,
                                  self._use_karatsuba)

        out_r, out_i = pl.pallas_call(
            kernel,
            out_shape=(jax.ShapeDtypeStruct((bc * N, N), jnp.float32),
                       jax.ShapeDtypeStruct((bc * N, N), jnp.float32)),
            grid_spec=pltpu.PrefetchScalarGridSpec(
                num_scalar_prefetch=0,
                grid=(grid,),
                in_specs=[fld_spec, fld_spec,
                          ac_spec, ac_spec, at_spec, at_spec, h_spec, h_spec],
                out_specs=(fld_spec, fld_spec),
                scratch_shapes=[pltpu.VMEM((rows, Npad), jnp.bfloat16),
                                pltpu.VMEM((rows, Npad), jnp.bfloat16)]),
            compiler_params=pltpu.CompilerParams(
                dimension_semantics=("parallel",),
                vmem_limit_bytes=vmem_limit),
            cost_estimate=cost,
        )(xr, xi, *self.consts)

        eout = (out_r + 1j * out_i).astype(jnp.complex64)
        eout = eout.reshape(lead + (N, N)) if lead else eout.reshape(N, N)
        if field.ndim == 2:
            return jnp.squeeze(eout)
        return eout


def _reference(field, prop):
    """Pure-jnp (jnp.fft, complex64) version of the same forward pass."""
    c = prop.crop
    pad = [(0, 0)] * (field.ndim - 2) + [(c, c), (c, c)]
    Ein = jnp.pad(field, pad)
    H = jnp.asarray(prop._h_np)
    f = jnp.fft.fftshift(
        jnp.fft.fft2(jnp.fft.ifftshift(Ein, axes=(-2, -1)), norm="ortho"),
        axes=(-2, -1))
    g = f * H
    e = jnp.fft.fftshift(
        jnp.fft.ifft2(jnp.fft.ifftshift(g, axes=(-2, -1)), norm="ortho"),
        axes=(-2, -1))
    return e[..., c:-c, c:-c]


if __name__ == "__main__":
    B, C, N = 2, 4, 16
    key = jax.random.PRNGKey(0)
    k1, k2 = jax.random.split(key)
    field = (jax.random.normal(k1, (B, C, N, N), dtype=jnp.float32)
             + 1j * jax.random.normal(k2, (B, C, N, N), dtype=jnp.float32)
             ).astype(jnp.complex64)

    prop = ASMPropPallas(wavelength=0.5e-6, dx=1.0e-6, distance=10.0e-6,
                         N=N, padding=0.5)

    out = jax.block_until_ready(prop(field))
    assert out.shape == (B, C, N, N) and out.dtype == jnp.complex64
    assert bool(jnp.all(jnp.isfinite(jnp.abs(out))))

    ref = jax.block_until_ready(_reference(field, prop))
    rel_err = float(jnp.max(jnp.abs(out - ref)) / jnp.max(jnp.abs(ref)))
    assert rel_err < 5e-2, f"mismatch vs jnp.fft reference: rel_err={rel_err}"

    print("KERNEL_OK")
</pallas_src>

<mosaic_0001>
module attributes {stable_mosaic.version = 11 : i64} {
  func.func @kernel(%arg0: i32, %arg1: memref<64x16xbf16, #tpu.memory_space<vmem>>, %arg2: memref<64x16xbf16, #tpu.memory_space<vmem>>, %arg3: memref<128x16xbf16, #tpu.memory_space<vmem>>, %arg4: memref<128x16xbf16, #tpu.memory_space<vmem>>, %arg5: memref<16x128xbf16, #tpu.memory_space<vmem>>, %arg6: memref<16x128xbf16, #tpu.memory_space<vmem>>, %arg7: memref<128x128xf32, #tpu.memory_space<vmem>>, %arg8: memref<128x128xf32, #tpu.memory_space<vmem>>, %arg9: memref<64x16xf32, #tpu.memory_space<vmem>>, %arg10: memref<64x16xf32, #tpu.memory_space<vmem>>, %arg11: memref<64x128xbf16, #tpu.memory_space<vmem>>, %arg12: memref<64x128xbf16, #tpu.memory_space<vmem>>) attributes {dimension_semantics = [#tpu.dimension_semantics<parallel>], iteration_bounds = array<i64: 2>, scalar_prefetch = 0 : i64, scratch_operands = 2 : i64, tpu.core_type = #tpu.core_type<tc>, window_params = [{transform_indices = @transform_0, window_bounds = array<i64: 64, 16>}, {transform_indices = @transform_1, window_bounds = array<i64: 64, 16>}, {pipeline_mode = #tpu.pipeline_mode<synchronous>, transform_indices = @transform_2, window_bounds = array<i64: 128, 16>}, {pipeline_mode = #tpu.pipeline_mode<synchronous>, transform_indices = @transform_3, window_bounds = array<i64: 128, 16>}, {pipeline_mode = #tpu.pipeline_mode<synchronous>, transform_indices = @transform_4, window_bounds = array<i64: 16, 128>}, {pipeline_mode = #tpu.pipeline_mode<synchronous>, transform_indices = @transform_5, window_bounds = array<i64: 16, 128>}, {pipeline_mode = #tpu.pipeline_mode<synchronous>, transform_indices = @transform_6, window_bounds = array<i64: 128, 128>}, {pipeline_mode = #tpu.pipeline_mode<synchronous>, transform_indices = @transform_7, window_bounds = array<i64: 128, 128>}, {transform_indices = @transform_8, window_bounds = array<i64: 64, 16>}, {transform_indices = @transform_9, window_bounds = array<i64: 64, 16>}]} {
    %c0 = arith.constant 0 : index
    %c0_0 = arith.constant 0 : index
    %0 = vector.load %arg3[%c0, %c0_0] : memref<128x16xbf16, #tpu.memory_space<vmem>>, vector<128x16xbf16>
    %c0_1 = arith.constant 0 : index
    %c0_2 = arith.constant 0 : index
    %1 = vector.load %arg4[%c0_1, %c0_2] : memref<128x16xbf16, #tpu.memory_space<vmem>>, vector<128x16xbf16>
    %c0_3 = arith.constant 0 : index
    %c0_4 = arith.constant 0 : index
    %2 = vector.load %arg5[%c0_3, %c0_4] : memref<16x128xbf16, #tpu.memory_space<vmem>>, vector<16x128xbf16>
    %c0_5 = arith.constant 0 : index
    %c0_6 = arith.constant 0 : index
    %3 = vector.load %arg6[%c0_5, %c0_6] : memref<16x128xbf16, #tpu.memory_space<vmem>>, vector<16x128xbf16>
    %cst = arith.constant 0.000000e+00 : bf16
    %4 = vector.broadcast %cst : bf16 to vector<16x128xbf16>
    %5 = arith.subf %4, %3 : vector<16x128xbf16>
    %cst_7 = arith.constant 0.000000e+00 : bf16
    %6 = vector.broadcast %cst_7 : bf16 to vector<128x16xbf16>
    %7 = arith.subf %6, %1 : vector<128x16xbf16>
    %c0_8 = arith.constant 0 : index
    %c0_9 = arith.constant 0 : index
    %8 = vector.load %arg1[%c0_8, %c0_9] : memref<64x16xbf16, #tpu.memory_space<vmem>>, vector<64x16xbf16>
    %c0_10 = arith.constant 0 : index
    %c0_11 = arith.constant 0 : index
    %9 = vector.load %arg2[%c0_10, %c0_11] : memref<64x16xbf16, #tpu.memory_space<vmem>>, vector<64x16xbf16>
    %cst_12 = arith.constant dense<0.000000e+00> : vector<64x128xf32>
    %10 = tpu.matmul %8, %2, %cst_12 {dimension_numbers = #tpu.dot_dimension_numbers<[1], [0], [0], [1], [0, 0, 1, 1], [], []>} : vector<64x16xbf16>, vector<16x128xbf16>, vector<64x128xf32> -> vector<64x128xf32>
    %cst_13 = arith.constant dense<0.000000e+00> : vector<64x128xf32>
    %11 = tpu.matmul %9, %3, %cst_13 {dimension_numbers = #tpu.dot_dimension_numbers<[1], [0], [0], [1], [0, 0, 1, 1], [], []>} : vector<64x16xbf16>, vector<16x128xbf16>, vector<64x128xf32> -> vector<64x128xf32>
    %cst_14 = arith.constant dense<0.000000e+00> : vector<64x128xf32>
    %12 = tpu.matmul %8, %3, %cst_14 {dimension_numbers = #tpu.dot_dimension_numbers<[1], [0], [0], [1], [0, 0, 1, 1], [], []>} : vector<64x16xbf16>, vector<16x128xbf16>, vector<64x128xf32> -> vector<64x128xf32>
    %cst_15 = arith.constant dense<0.000000e+00> : vector<64x128xf32>
    %13 = tpu.matmul %9, %2, %cst_15 {dimension_numbers = #tpu.dot_dimension_numbers<[1], [0], [0], [1], [0, 0, 1, 1], [], []>} : vector<64x16xbf16>, vector<16x128xbf16>, vector<64x128xf32> -> vector<64x128xf32>
    %14 = arith.subf %10, %11 : vector<64x128xf32>
    %15 = arith.addf %12, %13 : vector<64x128xf32>
    %16 = arith.truncf %14 : vector<64x128xf32> to vector<64x128xbf16>
    %c0_16 = arith.constant 0 : index
    %c0_17 = arith.constant 0 : index
    %17 = vector.load %arg11[%c0_16, %c0_17] : memref<64x128xbf16, #tpu.memory_space<vmem>>, vector<64x128xbf16>
    tpu.vector_store %arg11[%c0_16, %c0_17], %16 {strides = array<i32>} : memref<64x128xbf16, #tpu.memory_space<vmem>>, vector<64x128xbf16>,
    %18 = arith.truncf %15 : vector<64x128xf32> to vector<64x128xbf16>
    %c0_18 = arith.constant 0 : index
    %c0_19 = arith.constant 0 : index
    %19 = vector.load %arg12[%c0_18, %c0_19] : memref<64x128xbf16, #tpu.memory_space<vmem>>, vector<64x128xbf16>
    tpu.vector_store %arg12[%c0_18, %c0_19], %18 {strides = array<i32>} : memref<64x128xbf16, #tpu.memory_space<vmem>>, vector<64x128xbf16>,
    %c0_i32 = arith.constant 0 : i32
    %c4_i32 = arith.constant 4 : i32
    %20 = arith.addi %c0_i32, %c4_i32 : i32
    %c1_i32 = arith.constant 1 : i32
    scf.for %arg13 = %c0_i32 to %20 step %c1_i32  : i32 {
      %c16_i32 = arith.constant 16 : i32
      %31 = arith.muli %arg13, %c16_i32 : i32
      %32 = tpu.assume_multiple %31, 16 : i32
      %33 = arith.index_cast %32 : i32 to index
      %c0_33 = arith.constant 0 : index
      %34 = vector.load %arg11[%33, %c0_33] : memref<64x128xbf16, #tpu.memory_space<vmem>>, vector<16x128xbf16>
      %35 = arith.index_cast %32 : i32 to index
      %c0_34 = arith.constant 0 : index
      %36 = vector.load %arg12[%35, %c0_34] : memref<64x128xbf16, #tpu.memory_space<vmem>>, vector<16x128xbf16>
      %cst_35 = arith.constant dense<0.000000e+00> : vector<128x128xf32>
      %37 = tpu.matmul %0, %34, %cst_35 {dimension_numbers = #tpu.dot_dimension_numbers<[1], [0], [0], [1], [0, 0, 1, 1], [], []>} : vector<128x16xbf16>, vector<16x128xbf16>, vector<128x128xf32> -> vector<128x128xf32>
      %cst_36 = arith.constant dense<0.000000e+00> : vector<128x128xf32>
      %38 = tpu.matmul %1, %36, %cst_36 {dimension_numbers = #tpu.dot_dimension_numbers<[1], [0], [0], [1], [0, 0, 1, 1], [], []>} : vector<128x16xbf16>, vector<16x128xbf16>, vector<128x128xf32> -> vector<128x128xf32>
      %cst_37 = arith.constant dense<0.000000e+00> : vector<128x128xf32>
      %39 = tpu.matmul %0, %36, %cst_37 {dimension_numbers = #tpu.dot_dimension_numbers<[1], [0], [0], [1], [0, 0, 1, 1], [], []>} : vector<128x16xbf16>, vector<16x128xbf16>, vector<128x128xf32> -> vector<128x128xf32>
      %cst_38 = arith.constant dense<0.000000e+00> : vector<128x128xf32>
      %40 = tpu.matmul %1, %34, %cst_38 {dimension_numbers = #tpu.dot_dimension_numbers<[1], [0], [0], [1], [0, 0, 1, 1], [], []>} : vector<128x16xbf16>, vector<16x128xbf16>, vector<128x128xf32> -> vector<128x128xf32>
      %41 = arith.subf %37, %38 : vector<128x128xf32>
      %42 = arith.addf %39, %40 : vector<128x128xf32>
      %c0_39 = arith.constant 0 : index
      %c0_40 = arith.constant 0 : index
      %43 = vector.load %arg7[%c0_39, %c0_40] : memref<128x128xf32, #tpu.memory_space<vmem>>, vector<128x128xf32>
      %c0_41 = arith.constant 0 : index
      %c0_42 = arith.constant 0 : index
      %44 = vector.load %arg8[%c0_41, %c0_42] : memref<128x128xf32, #tpu.memory_space<vmem>>, vector<128x128xf32>
      %45 = arith.mulf %41, %43 : vector<128x128xf32>
      %46 = arith.mulf %42, %44 : vector<128x128xf32>
      %47 = arith.subf %45, %46 : vector<128x128xf32>
      %48 = arith.mulf %41, %44 : vector<128x128xf32>
      %49 = arith.mulf %42, %43 : vector<128x128xf32>
      %50 = arith.addf %48, %49 : vector<128x128xf32>
      %51 = arith.truncf %47 : vector<128x128xf32> to vector<128x128xbf16>
      %52 = arith.truncf %50 : vector<128x128xf32> to vector<128x128xbf16>
      %cst_43 = arith.constant dense<0.000000e+00> : vector<16x128xf32>
      %53 = tpu.matmul %2, %51, %cst_43 {dimension_numbers = #tpu.dot_dimension_numbers<[1], [0], [0], [1], [0, 0, 1, 1], [], []>} : vector<16x128xbf16>, vector<128x128xbf16>, vector<16x128xf32> -> vector<16x128xf32>
      %cst_44 = arith.constant dense<0.000000e+00> : vector<16x128xf32>
      %54 = tpu.matmul %5, %52, %cst_44 {dimension_numbers = #tpu.dot_dimension_numbers<[1], [0], [0], [1], [0, 0, 1, 1], [], []>} : vector<16x128xbf16>, vector<128x128xbf16>, vector<16x128xf32> -> vector<16x128xf32>
      %cst_45 = arith.constant dense<0.000000e+00> : vector<16x128xf32>
      %55 = tpu.matmul %2, %52, %cst_45 {dimension_numbers = #tpu.dot_dimension_numbers<[1], [0], [0], [1], [0, 0, 1, 1], [], []>} : vector<16x128xbf16>, vector<128x128xbf16>, vector<16x128xf32> -> vector<16x128xf32>
      %cst_46 = arith.constant dense<0.000000e+00> : vector<16x128xf32>
      %56 = tpu.matmul %5, %51, %cst_46 {dimension_numbers = #tpu.dot_dimension_numbers<[1], [0], [0], [1], [0, 0, 1, 1], [], []>} : vector<16x128xbf16>, vector<128x128xbf16>, vector<16x128xf32> -> vector<16x128xf32>
      %57 = arith.subf %53, %54 : vector<16x128xf32>
      %58 = arith.addf %55, %56 : vector<16x128xf32>
      %59 = arith.truncf %57 : vector<16x128xf32> to vector<16x128xbf16>
      %60 = arith.index_cast %32 : i32 to index
      %c0_47 = arith.constant 0 : index
      %61 = vector.load %arg11[%60, %c0_47] : memref<64x128xbf16, #tpu.memory_space<vmem>>, vector<16x128xbf16>
      tpu.vector_store %arg11[%60, %c0_47], %59 {strides = array<i32>} : memref<64x128xbf16, #tpu.memory_space<vmem>>, vector<16x128xbf16>,
      %62 = arith.truncf %58 : vector<16x128xf32> to vector<16x128xbf16>
      %63 = arith.index_cast %32 : i32 to index
      %c0_48 = arith.constant 0 : index
      %64 = vector.load %arg12[%63, %c0_48] : memref<64x128xbf16, #tpu.memory_space<vmem>>, vector<16x128xbf16>
      tpu.vector_store %arg12[%63, %c0_48], %62 {strides = array<i32>} : memref<64x128xbf16, #tpu.memory_space<vmem>>, vector<16x128xbf16>,
    }
    %c4_i32_20 = arith.constant 4 : i32
    %c0_21 = arith.constant 0 : index
    %c0_22 = arith.constant 0 : index
    %21 = vector.load %arg11[%c0_21, %c0_22] : memref<64x128xbf16, #tpu.memory_space<vmem>>, vector<64x128xbf16>
    %c0_23 = arith.constant 0 : index
    %c0_24 = arith.constant 0 : index
    %22 = vector.load %arg12[%c0_23, %c0_24] : memref<64x128xbf16, #tpu.memory_space<vmem>>, vector<64x128xbf16>
    %cst_25 = arith.constant dense<0.000000e+00> : vector<64x16xf32>
    %23 = tpu.matmul %21, %0, %cst_25 {dimension_numbers = #tpu.dot_dimension_numbers<[1], [0], [0], [1], [0, 0, 1, 1], [], []>} : vector<64x128xbf16>, vector<128x16xbf16>, vector<64x16xf32> -> vector<64x16xf32>
    %cst_26 = arith.constant dense<0.000000e+00> : vector<64x16xf32>
    %24 = tpu.matmul %22, %7, %cst_26 {dimension_numbers = #tpu.dot_dimension_numbers<[1], [0], [0], [1], [0, 0, 1, 1], [], []>} : vector<64x128xbf16>, vector<128x16xbf16>, vector<64x16xf32> -> vector<64x16xf32>
    %cst_27 = arith.constant dense<0.000000e+00> : vector<64x16xf32>
    %25 = tpu.matmul %21, %7, %cst_27 {dimension_numbers = #tpu.dot_dimension_numbers<[1], [0], [0], [1], [0, 0, 1, 1], [], []>} : vector<64x128xbf16>, vector<128x16xbf16>, vector<64x16xf32> -> vector<64x16xf32>
    %cst_28 = arith.constant dense<0.000000e+00> : vector<64x16xf32>
    %26 = tpu.matmul %22, %0, %cst_28 {dimension_numbers = #tpu.dot_dimension_numbers<[1], [0], [0], [1], [0, 0, 1, 1], [], []>} : vector<64x128xbf16>, vector<128x16xbf16>, vector<64x16xf32> -> vector<64x16xf32>
    %27 = arith.subf %23, %24 : vector<64x16xf32>
    %28 = arith.addf %25, %26 : vector<64x16xf32>
    %c0_29 = arith.constant 0 : index
    %c0_30 = arith.constant 0 : index
    %29 = vector.load %arg9[%c0_29, %c0_30] : memref<64x16xf32, #tpu.memory_space<vmem>>, vector<64x16xf32>
    tpu.vector_store %arg9[%c0_29, %c0_30], %27 {strides = array<i32>} : memref<64x16xf32, #tpu.memory_space<vmem>>, vector<64x16xf32>,
    %c0_31 = arith.constant 0 : index
    %c0_32 = arith.constant 0 : index
    %30 = vector.load %arg10[%c0_31, %c0_32] : memref<64x16xf32, #tpu.memory_space<vmem>>, vector<64x16xf32>
    tpu.vector_store %arg10[%c0_31, %c0_32], %28 {strides = array<i32>} : memref<64x16xf32, #tpu.memory_space<vmem>>, vector<64x16xf32>,
    return
  }
  func.func @transform_0(%arg0: i32) -> (i32, i32) {
    %c0_i32 = arith.constant 0 : i32
    %c0_i32_0 = arith.constant 0 : i32
    return %arg0, %c0_i32 : i32, i32
  }
  func.func @transform_1(%arg0: i32) -> (i32, i32) {
    %c0_i32 = arith.constant 0 : i32
    %c0_i32_0 = arith.constant 0 : i32
    return %arg0, %c0_i32 : i32, i32
  }
  func.func @transform_2(%arg0: i32) -> (i32, i32) {
    %c0_i32 = arith.constant 0 : i32
    %c0_i32_0 = arith.constant 0 : i32
    %c0_i32_1 = arith.constant 0 : i32
    return %c0_i32, %c0_i32_0 : i32, i32
  }
  func.func @transform_3(%arg0: i32) -> (i32, i32) {
    %c0_i32 = arith.constant 0 : i32
    %c0_i32_0 = arith.constant 0 : i32
    %c0_i32_1 = arith.constant 0 : i32
    return %c0_i32, %c0_i32_0 : i32, i32
  }
  func.func @transform_4(%arg0: i32) -> (i32, i32) {
    %c0_i32 = arith.constant 0 : i32
    %c0_i32_0 = arith.constant 0 : i32
    %c0_i32_1 = arith.constant 0 : i32
    return %c0_i32, %c0_i32_0 : i32, i32
  }
  func.func @transform_5(%arg0: i32) -> (i32, i32) {
    %c0_i32 = arith.constant 0 : i32
    %c0_i32_0 = arith.constant 0 : i32
    %c0_i32_1 = arith.constant 0 : i32
    return %c0_i32, %c0_i32_0 : i32, i32
  }
  func.func @transform_6(%arg0: i32) -> (i32, i32) {
    %c0_i32 = arith.constant 0 : i32
    %c0_i32_0 = arith.constant 0 : i32
    %c0_i32_1 = arith.constant 0 : i32
    return %c0_i32, %c0_i32_0 : i32, i32
  }
  func.func @transform_7(%arg0: i32) -> (i32, i32) {
    %c0_i32 = arith.constant 0 : i32
    %c0_i32_0 = arith.constant 0 : i32
    %c0_i32_1 = arith.constant 0 : i32
    return %c0_i32, %c0_i32_0 : i32, i32
  }
  func.func @transform_8(%arg0: i32) -> (i32, i32) {
    %c0_i32 = arith.constant 0 : i32
    %c0_i32_0 = arith.constant 0 : i32
    return %arg0, %c0_i32 : i32, i32
  }
  func.func @transform_9(%arg0: i32) -> (i32, i32) {
    %c0_i32 = arith.constant 0 : i32
    %c0_i32_0 = arith.constant 0 : i32
    return %arg0, %c0_i32 : i32, i32
  }
}

</mosaic_0001>

<bundles_post_ra>
// kernel: tpu_custom_call.1
= control target key start
LH: loop header
LB: loop body
LE: loop exit
PB: predicated region body
PF: predicated region fallthrough
CT: control target
= control target key end

     0   :  { %s2839_s30 = smov 0   ;;  %s3505_s0 = inlined_call_operand.vmem [shape: bf16[128,16], index: 0, kind: input, shape index: {}]   ;;  %s3506_s1 = inlined_call_operand.vmem [shape: bf16[128,16], index: 1, kind: input, shape index: {}]   ;;  %s3507_s2 = inlined_call_operand.vmem [shape: bf16[128,16], index: 2, kind: input, shape index: {}]   ;;  %s3508_s3 = inlined_call_operand.vmem [shape: bf16[128,16], index: 3, kind: input, shape index: {}]   ;;  %s3509_s4 = inlined_call_operand.vmem [shape: bf16[16,128], index: 4, kind: input, shape index: {}]   ;;  %s3510_s5 = inlined_call_operand.vmem [shape: bf16[16,128], index: 5, kind: input, shape index: {}]   ;;  %s3511_s6 = inlined_call_operand.vmem [shape: f32[128,128], index: 6, kind: input, shape index: {}]   ;;  %s3512_s7 = inlined_call_operand.vmem [shape: f32[128,128], index: 7, kind: input, shape index: {}]   ;;  %s3513_s8 = inlined_call_operand.vmem [shape: f32[128,16], index: 8, kind: output, shape index: {0}]   ;;  %s3514_s9 = inlined_call_operand.vmem [shape: f32[128,16], index: 9, kind: output, shape index: {1}]  }
   0x1 LB: > { %s2170_s10 = sadd.s32 4294967295, %s2781_s30   ;;  %p2174_p0 = scmp.ge.s32.totalorder %s2781_s30, 1  ;;  %s2781_s30 = sphi %s2839_s30, %s20_s30  }
   0x2   : > { %p302_p1 = scmp.lt.s32.totalorder %s2781_s30, 3 }
   0x4   : > { %p303_p2 = pnand %p2174_p0, %p302_p1 }
   0x6   : > { %306 = sbr.rel (%p303_p2) target bundleno = 1096 (0x448), region = 52 }
   0xd   : > { %v2850_v0 = vld [vmem:[%s3507_s2] sm:$0xf]  ;;  %v2855_v1 = vld [vmem:[%s3507_s2 + $0x4] sm:$0xf]  ;;  %v2860_v2 = vld [vmem:[%s3507_s2 + $0x8] sm:$0xf] }
   0xe   : > { %3523 = vst [vmem:[#allocation4_spill] sm:$0xff] %v2850_v0  ;;  %3524 = vst [vmem:[#allocation5_spill] sm:$0xff] %v2855_v1  ;;  %v2865_v3 = vld [vmem:[%s3507_s2 + $0xc] sm:$0xf]  ;;  %v2870_v4 = vld [vmem:[%s3507_s2 + $0x10] sm:$0xf] }
   0xf   : > { %3525 = vst [vmem:[#allocation6_spill] sm:$0xff] %v2860_v2  ;;  %3526 = vst [vmem:[#allocation7_spill] sm:$0xff] %v2865_v3  ;;  %v2875_v5 = vld [vmem:[%s3507_s2 + $0x14] sm:$0xf]  ;;  %v2880_v6 = vld [vmem:[%s3507_s2 + $0x18] sm:$0xf] }
  0x10   : > { %3527 = vst [vmem:[#allocation8_spill] sm:$0xff] %v2870_v4  ;;  %3528 = vst [vmem:[#allocation9_spill] sm:$0xff] %v2875_v5  ;;  %v2885_v7 = vld [vmem:[%s3507_s2 + $0x1c] sm:$0xf]  ;;  %v2890_v8 = vld [vmem:[%s3507_s2 + $0x20] sm:$0xf] }
  0x11   : > { %3529 = vst [vmem:[#allocation10_spill] sm:$0xff] %v2880_v6  ;;  %3530 = vst [vmem:[#allocation11_spill] sm:$0xff] %v2885_v7  ;;  %v2895_v9 = vld [vmem:[%s3507_s2 + $0x24] sm:$0xf]  ;;  %v2900_v10 = vld [vmem:[%s3507_s2 + $0x28] sm:$0xf] }
  0x12   : > { %3531 = vst [vmem:[#allocation12_spill] sm:$0xff] %v2890_v8  ;;  %3532 = vst [vmem:[#allocation13_spill] sm:$0xff] %v2895_v9  ;;  %v2905_v11 = vld [vmem:[%s3507_s2 + $0x2c] sm:$0xf]  ;;  %v2910_v12 = vld [vmem:[%s3507_s2 + $0x30] sm:$0xf] }
  0x13   : > { %3533 = vst [vmem:[#allocation14_spill] sm:$0xff] %v2900_v10  ;;  %3534 = vst [vmem:[#allocation15_spill] sm:$0xff] %v2905_v11  ;;  %v2915_v13 = vld [vmem:[%s3507_s2 + $0x34] sm:$0xf]  ;;  %v2920_v14 = vld [vmem:[%s3507_s2 + $0x38] sm:$0xf] }
  0x14   : > { %3535 = vst [vmem:[#allocation16_spill] sm:$0xff] %v2910_v12  ;;  %3536 = vst [vmem:[#allocation17_spill] sm:$0xff] %v2915_v13  ;;  %v2925_v15 = vld [vmem:[%s3507_s2 + $0x3c] sm:$0xf]  ;;  %v2930_v16 = vld [vmem:[%s3508_s3] sm:$0xf] }
  0x15   : > { %3537 = vst [vmem:[#allocation18_spill] sm:$0xff] %v2920_v14  ;;  %3538 = vst [vmem:[#allocation19_spill] sm:$0xff] %v2925_v15  ;;  %v2935_v17 = vld [vmem:[%s3508_s3 + $0x4] sm:$0xf]  ;;  %v2940_v18 = vld [vmem:[%s3508_s3 + $0x8] sm:$0xf] }
  0x16   : > { %v2945_v19 = vld [vmem:[%s3508_s3 + $0xc] sm:$0xf]  ;;  %v2950_v20 = vld [vmem:[%s3508_s3 + $0x10] sm:$0xf]  ;;  %v2955_v21 = vld [vmem:[%s3508_s3 + $0x14] sm:$0xf] }
  0x17   : > { %v2960_v22 = vld [vmem:[%s3508_s3 + $0x18] sm:$0xf]  ;;  %v2965_v23 = vld [vmem:[%s3508_s3 + $0x1c] sm:$0xf]  ;;  %v2970_v24 = vld [vmem:[%s3508_s3 + $0x20] sm:$0xf] }
  0x18   : > { %v2975_v25 = vld [vmem:[%s3508_s3 + $0x24] sm:$0xf]  ;;  %v2980_v26 = vld [vmem:[%s3508_s3 + $0x28] sm:$0xf]  ;;  %v2985_v27 = vld [vmem:[%s3508_s3 + $0x2c] sm:$0xf] }
  0x19   : > { %3539 = vst [vmem:[#allocation20_spill] sm:$0xff] %v2980_v26  ;;  %3540 = vst [vmem:[#allocation21_spill] sm:$0xff] %v2985_v27  ;;  %v2990_v28 = vld [vmem:[%s3508_s3 + $0x30] sm:$0xf]  ;;  %v2995_v29 = vld [vmem:[%s3508_s3 + $0x34] sm:$0xf] }
  0x1a   : > { %3541 = vst [vmem:[#allocation22_spill] sm:$0xff] %v2990_v28  ;;  %3542 = vst [vmem:[#allocation23_spill] sm:$0xff] %v2995_v29  ;;  %v3000_v30 = vld [vmem:[%s3508_s3 + $0x38] sm:$0xf]  ;;  %v3005_v31 = vld [vmem:[%s3508_s3 + $0x3c] sm:$0xf] }
  0x1b   : > { %3543 = vst [vmem:[#allocation24_spill] sm:$0xff] %v3000_v30  ;;  %3544 = vst [vmem:[#allocation25_spill] sm:$0xff] %v3005_v31  ;;  %v3018_v40 = vld [vmem:[%s3509_s4] sm:$0xff]   ;;  %s2175_s20 = sshll.u32 %s2170_s10, 3  ;;  %vm469_vm0 = vcmask 130048   ;;  %s3080_s19 = smov 0  }
  0x1c   : > { %p349_p3 = scmp.lt.s32.totalorder %s2175_s20, 15  ;;  %2419 = vmatprep.subr.bf16.mxu1 %v3018_v40  ;;  %2439 = vmatprep.subr.bf16.mxu0 %v3018_v40  ;;  %v3035_v49 = vld [vmem:[%s3510_s5] sm:$0xf]  ;;  %v3042_v50 = vld [vmem:[%s3510_s5 + $0x4] sm:$0xf] }
  0x1d   : > { %2420 = vmatpush3.bf16.msra.mxu1 %v3018_v40  ;;  %2440 = vmatpush3.bf16.msra.mxu0 %v3018_v40  ;;  %v2196_v53 = vcombine.low %v3035_v49, %v3042_v50 }
  0x1e   : > { %s3593_s20 = smov (!%p349_p3, %s2175_s20), 15 }
  0x1f   : > { %s2176_s24 = sshll.u32 %s3593_s20, 2  ;;  %s2180_s25 = sshll.u32 %s3593_s20, 3  ;;  %2429 = vmatprep.subr.bf16.mxu1 %v2196_v53  ;;  %2449 = vmatprep.subr.bf16.mxu0 %v2196_v53 }
  0x20   : > { %s352_s28 = scalar_lea.vmem %s3505_s0, %s2176_s24  ;;  %s3054_s12 = scalar_lea.vmem %s3513_s8, %s2180_s25 }
  0x21   : > { %s3059_s15 = scalar_lea.vmem %s3514_s9, %s2180_s25  ;;  %v2762_v54 = vld [vmem:[%s352_s28] sm:$0xff]   ;;  %s358_s18 = scalar_lea.vmem %s3506_s1, %s2176_s24  ;;  %v2765_v56 = vld [vmem:[%s352_s28 + $0x8] sm:$0xff]   ;;  %v2767_v58 = vld [vmem:[%s352_s28 + $0x10] sm:$0xff]  }
  0x22   : > { %v2764_v55 = vld [vmem:[%s358_s18] sm:$0xff]   ;;  %2421 = vmatprep.mubr.msk.bf16.mxu1 %vm469_vm0, %v2762_v54  ;;  %v2766_v57 = vld [vmem:[%s358_s18 + $0x8] sm:$0xff]   ;;  %v2768_v59 = vld [vmem:[%s358_s18 + $0x10] sm:$0xff]  }
  0x23   : > { %2441 = vmatprep.mubr.msk.bf16.mxu0 %vm469_vm0, %v2764_v55  ;;  %2422 = vmatmul.mubr.msk.bf16.vlgmr.msra.gmra.mrb[0].mxu1 %vm469_vm0, %v2765_v56  ;;  %v2769_v60 = vld [vmem:[%s352_s28 + $0x18] sm:$0xff]  }
  0x24   : > { %2430 = vmatpush3.bf16.msra.mxu1 %v2196_v53  ;;  %2442 = vmatmul.mubr.msk.bf16.vlgmr.msra.gmra.mrb[0].mxu0 %vm469_vm0, %v2766_v57  ;;  %v2770_v61 = vld [vmem:[%s358_s18 + $0x18] sm:$0xff]  }
  0x25   : > { %2450 = vmatpush3.bf16.msra.mxu0 %v2196_v53  ;;  %2425 = vmatprep.mubr.msk.bf16.mxu1 %vm469_vm0, %v2767_v58 }
  0x26   : > { %2445 = vmatprep.mubr.msk.bf16.mxu0 %vm469_vm0, %v2768_v59 }
  0x2b   : > { %2426 = vmatmul.mubr.msk.bf16.gmra.mrb[4].mxu1 %vm469_vm0, %v2769_v60 }
  0x2c   : > { %2446 = vmatmul.mubr.msk.bf16.gmra.mrb[4].mxu0 %vm469_vm0, %v2770_v61  ;;  %2431 = vmatprep.mubr.msk.bf16.mxu1 %vm469_vm0, %v2764_v55 }
  0x2d   : > { %2451 = vmatprep.mubr.msk.bf16.mxu0 %vm469_vm0, %v2762_v54 }
  0x33   : > { %2432 = vmatmul.mubr.msk.bf16.vlgmr.msra.gmra.mrb[8].mxu1 %vm469_vm0, %v2766_v57 }
  0x34   : > { %2452 = vmatmul.mubr.msk.bf16.vlgmr.msra.gmra.mrb[0].mxu0 %vm469_vm0, %v2765_v56  ;;  %2435 = vmatprep.mubr.msk.bf16.mxu1 %vm469_vm0, %v2768_v59 }
  0x35   : > { %2455 = vmatprep.mubr.msk.bf16.mxu0 %vm469_vm0, %v2767_v58 }
  0x3b   : > { %2436 = vmatmul.mubr.msk.bf16.gmra.mrb[12].mxu1 %vm469_vm0, %v2770_v61 }
  0x3c   : > { %2456 = vmatmul.mubr.msk.bf16.gmra.mrb[4].mxu0 %vm469_vm0, %v2769_v60 }
  0xf6   : > { %v2423_v62 = vpop.f32.mrb[0].mxu1 }
  0xf7   : > { %v516_v63 = vpop.f32.mrb[1].mxu1 }
  0xf8   : > { %v2424_v53 = vpop.f32.mrb[2].mxu1 }
  0xf9   : > { %v519_v47 = vpop.f32.mrb[3].mxu1 }
  0xfe   : > { %v2427_v48 = vpop.f32.mrb[4].mxu1 }
  0xff   : > { %v532_v55 = vpop.f32.mrb[5].mxu1 }
 0x100   : > { %v2428_v45 = vpop.f32.mrb[6].mxu1 }
 0x101   : > { %v535_v54 = vpop.f32.mrb[7].mxu1 }
 0x106   : > { %v2433_v46 = vpop.f32.mrb[8].mxu1 }
 0x107   : > { %v717_v57 = vsub.f32 %v2423_v62, %v2433_v46  ;;  %v2453_v43 = vpop.f32.mrb[0].mxu0  ;;  %v619_v56 = vpop.f32.mrb[9].mxu1 }
 0x108   : > { %v715_v44 = vsub.f32 %v516_v63, %v619_v56  ;;  %v757_v59 = vpop.f32.mrb[1].mxu0  ;;  %v2434_v41 = vpop.f32.mrb[10].mxu1 }
 0x109   : > { %v718_v58 = vsub.f32 %v2424_v53, %v2434_v41  ;;  %v2454_v42 = vpop.f32.mrb[2].mxu0  ;;  %v622_v61 = vpop.f32.mrb[11].mxu1 }
 0x10a   : > { %v797_v38 = vpack.c.bf16 %v2454_v42, %v2453_v43  ;;  %v716_v60 = vsub.f32 %v519_v47, %v622_v61  ;;  %v760_v39 = vpop.f32.mrb[3].mxu0 }
 0x10b   : > { %v789_v36 = vpack.c.bf16 %v718_v58, %v717_v57  ;;  %v796_v37 = vpack.c.bf16 %v760_v39, %v757_v59 }
 0x10c   : > { %801 = vst [vmem:[#allocation3 + $0x8] sm:$0xff] %v797_v38  ;;  %v788_v34 = vpack.c.bf16 %v716_v60, %v715_v44 }
 0x10d   : > { %793 = vst [vmem:[#allocation2 + $0x8] sm:$0xff] %v789_v36  ;;  %800 = vst [vmem:[#allocation3] sm:$0xff] %v796_v37 }
 0x10e   : > { %792 = vst [vmem:[#allocation2] sm:$0xff] %v788_v34  ;;  %v2437_v35 = vpop.f32.mrb[12].mxu1 }
 0x10f   : > { %v721_v46 = vsub.f32 %v2427_v48, %v2437_v35  ;;  %v2457_v62 = vpop.f32.mrb[4].mxu0  ;;  %v635_v32 = vpop.f32.mrb[13].mxu1 }
 0x110   : > { %v719_v63 = vsub.f32 %v532_v55, %v635_v32  ;;  %v773_v56 = vpop.f32.mrb[5].mxu0  ;;  %v2438_v33 = vpop.f32.mrb[14].mxu1 }
 0x111   : > { %v722_v41 = vsub.f32 %v2428_v45, %v2438_v33  ;;  %v2458_v53 = vpop.f32.mrb[6].mxu0  ;;  %v638_v51 = vpop.f32.mrb[15].mxu1 }
 0x112   : > { %v799_v42 = vpack.c.bf16 %v2458_v53, %v2457_v62  ;;  %v720_v43 = vsub.f32 %v535_v54, %v638_v51  ;;  %v776_v47 = vpop.f32.mrb[7].mxu0 }
 0x113   : > { %v791_v57 = vpack.c.bf16 %v722_v41, %v721_v46  ;;  %v798_v39 = vpack.c.bf16 %v776_v47, %v773_v56 }
 0x114   : > { %803 = vst [vmem:[#allocation3 + $0x18] sm:$0xff] %v799_v42  ;;  %v790_v38 = vpack.c.bf16 %v720_v43, %v719_v63 }
 0x115   : > { %795 = vst [vmem:[#allocation2 + $0x18] sm:$0xff] %v791_v57  ;;  %802 = vst [vmem:[#allocation3 + $0x10] sm:$0xff] %v798_v39 }
 0x116   : > { %794 = vst [vmem:[#allocation2 + $0x10] sm:$0xff] %v790_v38 }
 0x117 LB: >> { %v3545_v1 = vld [vmem:[#allocation5_spill] sm:$0xff]  ;;  %v3546_v0 = vld [vmem:[#allocation4_spill] sm:$0xff]  ;;  %v2228_v33 = vcombine.low %v2930_v16, %v2935_v17  ;;  %s2209_s20 = sshll.u32 %s2785_s19, 4  ;;  %v3547_v3 = vld [vmem:[#allocation7_spill] sm:$0xff]  ;;  %v2229_v37 = vcombine.low %v2940_v18, %v2945_v19  ;;  %v2230_v45 = vcombine.low %v2950_v20, %v2955_v21  ;;  %v2231_v51 = vcombine.low %v2960_v22, %v2965_v23  ;;  %s809_s19 = sadd.s32 1, %s2785_s19   ;;  %s2785_s19 = sphi %s3080_s19, %s809_s19  }
 0x118   : >> { %v3087_v32 = vcombine.low %v3546_v0, %v3545_v1  ;;  %s811_s10 = sshra.s32 %s2209_s20, 4  ;;  %v3548_v2 = vld [vmem:[#allocation6_spill] sm:$0xff]  ;;  %v3549_v5 = vld [vmem:[#allocation9_spill] sm:$0xff]  ;;  %v3550_v4 = vld [vmem:[#allocation8_spill] sm:$0xff]  ;;  %v2232_v54 = vcombine.low %v2970_v24, %v2975_v25  ;;  %v3515_v63 = vmov 0.0   ;;  %vm2788_vm1 = vmmov 0  }
 0x119   : >> { %2497 = vmatprep.mubr.msk.bf16.mxu0 %vm469_vm0, %v2228_v33  ;;  %s2210_s21 = sshll.u32 %s811_s10, 3  ;;  %v3103_v36 = vcombine.low %v3548_v2, %v3547_v3  ;;  %v3109_v44 = vcombine.low %v3550_v4, %v3549_v5  ;;  %v3551_v7 = vld [vmem:[#allocation11_spill] sm:$0xff]  ;;  %v3552_v6 = vld [vmem:[#allocation10_spill] sm:$0xff]  ;;  %v3553_v9 = vld [vmem:[#allocation13_spill] sm:$0xff]  ;;  %p806_p4 = scmp.ge.s32.totalorder %s809_s19, 4  }
 0x11a   : >> { %2461 = vmatprep.mubr.msk.bf16.mxu1 %vm469_vm0, %v3087_v32  ;;  %s3095_s22 = scalar_lea.vmem [#allocation2], %s2210_s21  ;;  %s3098_s23 = scalar_lea.vmem [#allocation3], %s2210_s21  ;;  %v3121_v48 = vcombine.low %v3552_v6, %v3551_v7  ;;  %v3554_v8 = vld [vmem:[#allocation12_spill] sm:$0xff]  ;;  %v3555_v11 = vld [vmem:[#allocation15_spill] sm:$0xff]  ;;  %v3556_v10 = vld [vmem:[#allocation14_spill] sm:$0xff] }
 0x11b   : >> { %v3127_v55 = vcombine.low %v3554_v8, %v3553_v9  ;;  %v3139_v59 = vcombine.low %v3556_v10, %v3555_v11  ;;  %v3557_v27 = vld [vmem:[#allocation21_spill] sm:$0xff]  ;;  %v3558_v26 = vld [vmem:[#allocation20_spill] sm:$0xff]  ;;  %v3561_v29 = vld [vmem:[#allocation23_spill] sm:$0xff] }
 0x11c   : >> { %v818_v35 = vld [vmem:[%s3098_s23] sm:$0xff]  ;;  %v2233_v58 = vcombine.low %v3558_v26, %v3557_v27  ;;  %v3559_v13 = vld [vmem:[#allocation17_spill] sm:$0xff]  ;;  %v3562_v28 = vld [vmem:[#allocation22_spill] sm:$0xff] }
 0x11d   : >> { %v815_v34 = vld [vmem:[%s3095_s22] sm:$0xff]  ;;  %v2234_v60 = vcombine.low %v3562_v28, %v3561_v29  ;;  %v3563_v15 = vld [vmem:[#allocation19_spill] sm:$0xff]  ;;  %v3564_v14 = vld [vmem:[#allocation18_spill] sm:$0xff] }
 0x11e   : >> { %2459 = vmatprep.subr.bf16.mxu1 %v815_v34  ;;  %2495 = vmatprep.subr.bf16.mxu0 %v815_v34  ;;  %v3560_v12 = vld [vmem:[#allocation16_spill] sm:$0xff]  ;;  %v3157_v46 = vcombine.low %v3564_v14, %v3563_v15  ;;  %v3565_v31 = vld [vmem:[#allocation25_spill] sm:$0xff]  ;;  %v1370_v1 = vld [vmem:[%s3512_s7 + $0x18] sm:$0xff] }
 0x11f   : >> { %2460 = vmatpush3.bf16.msra.mxu1 %v815_v34  ;;  %2496 = vmatpush3.bf16.msra.mxu0 %v815_v34  ;;  %v3145_v61 = vcombine.low %v3560_v12, %v3559_v13  ;;  %v3566_v30 = vld [vmem:[#allocation24_spill] sm:$0xff]  ;;  %v1354_v6 = vld [vmem:[%s3511_s6 + $0x18] sm:$0xff]  ;;  %v1352_v27 = vld [vmem:[%s3511_s6 + $0x8] sm:$0xff] }
 0x120   : >> { %2477 = vmatprep.subr.bf16.mxu1 %v818_v35  ;;  %2513 = vmatprep.subr.bf16.mxu0 %v818_v35  ;;  %v2235_v62 = vcombine.low %v3566_v30, %v3565_v31  ;;  %v1367_v52 = vld [vmem:[%s3512_s7] sm:$0xff] }
 0x122   : >> { %2462 = vmatmul.mubr.msk.bf16.vlgmr.msra.gmra.mrb[0].mxu1 %vm469_vm0, %v3103_v36  ;;  %2498 = vmatmul.mubr.msk.bf16.vlgmr.msra.gmra.mrb[0].mxu0 %vm469_vm0, %v2229_v37 }
 0x123   : >> { %2478 = vmatpush3.bf16.msra.mxu1 %v818_v35  ;;  %2514 = vmatpush3.bf16.msra.mxu0 %v818_v35 }
 0x124   : >> { %2465 = vmatprep.mubr.msk.bf16.mxu1 %vm469_vm0, %v3109_v44  ;;  %2501 = vmatprep.mubr.msk.bf16.mxu0 %vm469_vm0, %v2230_v45 }
 0x125   : >> { %2531 = vmatprep.subr.bf16.mxu1 %v3515_v63  ;;  %2571 = vmatprep.subr.bf16.mxu0 %v3515_v63 }
 0x12a   : >> { %2466 = vmatmul.mubr.msk.bf16.gmra.mrb[4].mxu1 %vm469_vm0, %v3121_v48  ;;  %2502 = vmatmul.mubr.msk.bf16.gmra.mrb[4].mxu0 %vm469_vm0, %v2231_v51 }
 0x12b   : >> { %2469 = vmatprep.mubr.msk.bf16.mxu1 %vm469_vm0, %v3127_v55  ;;  %2505 = vmatprep.mubr.msk.bf16.mxu0 %vm469_vm0, %v2232_v54 }
 0x132   : >> { %2470 = vmatmul.mubr.msk.bf16.gmra.mrb[8].mxu1 %vm469_vm0, %v3139_v59  ;;  %2506 = vmatmul.mubr.msk.bf16.gmra.mrb[8].mxu0 %vm469_vm0, %v2233_v58 }
 0x133   : >> { %2473 = vmatprep.mubr.msk.bf16.mxu1 %vm469_vm0, %v3145_v61  ;;  %2509 = vmatprep.mubr.msk.bf16.mxu0 %vm469_vm0, %v2234_v60 }
 0x13a   : >> { %2474 = vmatmul.mubr.msk.bf16.gmra.mrb[12].mxu1 %vm469_vm0, %v3157_v46  ;;  %2510 = vmatmul.mubr.msk.bf16.gmra.mrb[12].mxu0 %vm469_vm0, %v2235_v62 }
 0x13b   : >> { %2479 = vmatprep.mubr.msk.bf16.mxu1 %vm469_vm0, %v2228_v33  ;;  %2515 = vmatprep.mubr.msk.bf16.mxu0 %vm469_vm0, %v3087_v32 }
 0x142   : >> { %2480 = vmatmul.mubr.msk.bf16.vlgmr.msra.gmra.mrb[16].mxu1 %vm469_vm0, %v2229_v37  ;;  %2516 = vmatmul.mubr.msk.bf16.vlgmr.msra.gmra.mrb[0].mxu0 %vm469_vm0, %v3103_v36 }
 0x143   : >> { %2483 = vmatprep.mubr.msk.bf16.mxu1 %vm469_vm0, %v2230_v45  ;;  %2519 = vmatprep.mubr.msk.bf16.mxu0 %vm469_vm0, %v3109_v44 }
 0x14a   : >> { %2484 = vmatmul.mubr.msk.bf16.gmra.mrb[20].mxu1 %vm469_vm0, %v2231_v51  ;;  %2520 = vmatmul.mubr.msk.bf16.gmra.mrb[4].mxu0 %vm469_vm0, %v3121_v48 }
 0x14b   : >> { %2487 = vmatprep.mubr.msk.bf16.mxu1 %vm469_vm0, %v2232_v54  ;;  %2523 = vmatprep.mubr.msk.bf16.mxu0 %vm469_vm0, %v3127_v55 }
 0x152   : >> { %2488 = vmatmul.mubr.msk.bf16.gmra.mrb[24].mxu1 %vm469_vm0, %v2233_v58  ;;  %2524 = vmatmul.mubr.msk.bf16.gmra.mrb[8].mxu0 %vm469_vm0, %v3139_v59  ;;  %v1369_v58 = vld [vmem:[%s3512_s7 + $0x10] sm:$0xff] }
 0x153   : >> { %2491 = vmatprep.mubr.msk.bf16.mxu1 %vm469_vm0, %v2234_v60  ;;  %2527 = vmatprep.mubr.msk.bf16.mxu0 %vm469_vm0, %v3145_v61  ;;  %v1353_v60 = vld [vmem:[%s3511_s6 + $0x10] sm:$0xff] }
 0x15a   : >> { %2492 = vmatmul.mubr.msk.bf16.gmra.mrb[28].mxu1 %vm469_vm0, %v2235_v62  ;;  %2528 = vmatmul.mubr.msk.bf16.gmra.mrb[12].mxu0 %vm469_vm0, %v3157_v46  ;;  %v1351_v62 = vld [vmem:[%s3511_s6] sm:$0xff] }
 0x15b   : >> { %2547 = vmatprep.mubr.msk.bf16.mxu1 %vm2788_vm1, %v3515_v63  ;;  %2587 = vmatprep.mubr.msk.bf16.mxu0 %vm2788_vm1, %v3515_v63 }
 0x1f5   : >> { %v2463_v56 = vpop.f32.mrb[0].mxu1 }
 0x1f6   : >> { %v917_v41 = vpop.f32.mrb[1].mxu1 }
 0x1f7   : >> { %v2464_v53 = vpop.f32.mrb[2].mxu1 }
 0x1f8   : >> { %v920_v42 = vpop.f32.mrb[3].mxu1 }
 0x1fd   : >> { %v3194_v43 = vpop.f32.mrb[4].mxu1 }
 0x1fe   : >> { %v3196_v47 = vpop.f32.mrb[5].mxu1 }
 0x1ff   : >> { %v3198_v57 = vpop.f32.mrb[6].mxu1 }
 0x200   : >> { %v3200_v39 = vpop.f32.mrb[7].mxu1 }
 0x205   : >> { %v3202_v38 = vpop.f32.mrb[8].mxu1 }
 0x206   : >> { %v3204_v33 = vpop.f32.mrb[9].mxu1 }
 0x207   : >> { %v3206_v34 = vpop.f32.mrb[10].mxu1 }
 0x208   : >> { %v3208_v35 = vpop.f32.mrb[11].mxu1 }
 0x20d   : >> { %v3210_v37 = vpop.f32.mrb[12].mxu1 }
 0x20e   : >> { %v3212_v45 = vpop.f32.mrb[13].mxu1 }
 0x20f   : >> { %v3214_v51 = vpop.f32.mrb[14].mxu1 }
 0x210   : >> { %v3216_v54 = vpop.f32.mrb[15].mxu1 }
 0x215   : >> { %v2481_v63 = vpop.f32.mrb[16].mxu1  ;;  %v2517_v0 = vpop.f32.mrb[0].mxu0 }
 0x216   : >> { %v1240_v2 = vsub.f32 %v2463_v56, %v2481_v63  ;;  %v1401_v3 = vmul.f32 %v2517_v0, %v1369_v58  ;;  %v1078_v4 = vpop.f32.mrb[17].mxu1  ;;  %v1288_v5 = vpop.f32.mrb[1].mxu0  ;;  %v1449_v7 = vmul.f32 %v2517_v0, %v1353_v60  ;;  %v1368_v0 = vld [vmem:[%s3512_s7 + $0x8] sm:$0xff] }
 0x217   : >> { %v1238_v8 = vsub.f32 %v917_v41, %v1078_v4  ;;  %v1399_v9 = vmul.f32 %v1367_v52, %v1288_v5  ;;  %v1447_v10 = vmul.f32 %v1351_v62, %v1288_v5  ;;  %v2482_v11 = vpop.f32.mrb[18].mxu1  ;;  %v2518_v12 = vpop.f32.mrb[2].mxu0 }
 0x218   : >> { %v1385_v13 = vmul.f32 %v1353_v60, %v1240_v2  ;;  %v1433_v14 = vmul.f32 %v1369_v58, %v1240_v2  ;;  %v1241_v15 = vsub.f32 %v2464_v53, %v2482_v11  ;;  %v1402_v30 = vmul.f32 %v2518_v12, %v1370_v1  ;;  %v1081_v31 = vpop.f32.mrb[19].mxu1  ;;  %v1291_v28 = vpop.f32.mrb[3].mxu0 }
 0x219   : >> { %v1383_v63 = vmul.f32 %v1351_v62, %v1238_v8  ;;  %v1431_v56 = vmul.f32 %v1367_v52, %v1238_v8  ;;  %v1450_v29 = vmul.f32 %v2518_v12, %v1354_v6  ;;  %v1239_v26 = vsub.f32 %v920_v42, %v1081_v31  ;;  %v1357_v52 = vld [vmem:[%s3511_s6 + $0x30] sm:$0xff] }
 0x21a   : >> { %v1417_v4 = vsub.f32 %v1385_v13, %v1401_v3  ;;  %v1465_v5 = vadd.f32 %v1449_v7, %v1433_v14  ;;  %v1386_v41 = vmul.f32 %v1354_v6, %v1241_v15  ;;  %v1434_v2 = vmul.f32 %v1370_v1, %v1241_v15  ;;  %v1373_v42 = vld [vmem:[%s3512_s7 + $0x30] sm:$0xff]  ;;  %v1355_v1 = vld [vmem:[%s3511_s6 + $0x20] sm:$0xff] }
 0x21b   : >> { %v1415_v11 = vsub.f32 %v1383_v63, %v1399_v9  ;;  %v1463_v53 = vadd.f32 %v1447_v10, %v1431_v56  ;;  %v1384_v58 = vmul.f32 %v1352_v27, %v1239_v26  ;;  %v1432_v60 = vmul.f32 %v1368_v0, %v1239_v26  ;;  %v1371_v6 = vld [vmem:[%s3512_s7 + $0x20] sm:$0xff]  ;;  %v1358_v56 = vld [vmem:[%s3511_s6 + $0x38] sm:$0xff] }
 0x21c   : >> { %v1418_v62 = vsub.f32 %v1386_v41, %v1402_v30  ;;  %v1466_v8 = vadd.f32 %v1450_v29, %v1434_v2  ;;  %v1400_v12 = vmul.f32 %v1368_v0, %v1291_v28  ;;  %v1448_v31 = vmul.f32 %v1352_v27, %v1291_v28  ;;  %v1374_v0 = vld [vmem:[%s3512_s7 + $0x38] sm:$0xff] }
 0x21d   : >> { %v2485_v3 = vpop.f32.mrb[20].mxu1  ;;  %v2521_v7 = vpop.f32.mrb[4].mxu0 }
 0x21e   : >> { %v1480_v9 = vpack.c.bf16 %v1418_v62, %v1417_v4  ;;  %v3254_v10 = vpack.c.bf16 %v1466_v8, %v1465_v5  ;;  %v1416_v13 = vsub.f32 %v1384_v58, %v1400_v12  ;;  %v1464_v14 = vadd.f32 %v1448_v31, %v1432_v60  ;;  %v1094_v15 = vpop.f32.mrb[21].mxu1  ;;  %v1304_v26 = vpop.f32.mrb[5].mxu0 }
 0x21f   : >> { %v1244_v27 = vsub.f32 %v3194_v43, %v2485_v3  ;;  %v1405_v28 = vmul.f32 %v2521_v7, %v1373_v42  ;;  %v1453_v29 = vmul.f32 %v2521_v7, %v1357_v52  ;;  %v1242_v30 = vsub.f32 %v3196_v47, %v1094_v15  ;;  %v2486_v63 = vpop.f32.mrb[22].mxu1  ;;  %v2522_v4 = vpop.f32.mrb[6].mxu0 }
 0x220   : >> { %v1479_v5 = vpack.c.bf16 %v1416_v13, %v1415_v11  ;;  %v3264_v41 = vpack.c.bf16 %v1464_v14, %v1463_v53  ;;  %v1403_v2 = vmul.f32 %v1371_v6, %v1304_v26  ;;  %v1451_v58 = vmul.f32 %v1355_v1, %v1304_v26  ;;  %v1097_v43 = vpop.f32.mrb[23].mxu1  ;;  %v1307_v60 = vpop.f32.mrb[7].mxu0  ;;  %v1356_v11 = vld [vmem:[%s3511_s6 + $0x28] sm:$0xff] }
 0x221   : >> { %v1389_v62 = vmul.f32 %v1357_v52, %v1244_v27  ;;  %v1437_v8 = vmul.f32 %v1373_v42, %v1244_v27  ;;  %v1387_v47 = vmul.f32 %v1355_v1, %v1242_v30  ;;  %v1435_v12 = vmul.f32 %v1371_v6, %v1242_v30  ;;  %v1372_v53 = vld [vmem:[%s3512_s7 + $0x28] sm:$0xff]  ;;  %v1361_v30 = vld [vmem:[%s3511_s6 + $0x50] sm:$0xff] }
 0x222   : >> { %v1245_v31 = vsub.f32 %v3198_v57, %v2486_v63  ;;  %v1406_v3 = vmul.f32 %v2522_v4, %v1374_v0  ;;  %v1454_v7 = vmul.f32 %v2522_v4, %v1358_v56  ;;  %v1243_v15 = vsub.f32 %v3200_v39, %v1097_v43  ;;  %2532 = vmatpush3.bf16.msra.mxu1 %v1479_v5  ;;  %v1377_v57 = vld [vmem:[%s3512_s7 + $0x50] sm:$0xff] }
 0x223   : >> { %v1421_v13 = vsub.f32 %v1389_v62, %v1405_v28  ;;  %v1469_v52 = vadd.f32 %v1453_v29, %v1437_v8  ;;  %v1419_v42 = vsub.f32 %v1387_v47, %v1403_v2  ;;  %v1467_v1 = vadd.f32 %v1451_v58, %v1435_v12  ;;  %2572 = vmatpush3.bf16.msra.mxu0 %v1479_v5 }
 0x224   : >> { %v1390_v6 = vmul.f32 %v1358_v56, %v1245_v31  ;;  %v1438_v39 = vmul.f32 %v1374_v0, %v1245_v31  ;;  %v1388_v14 = vmul.f32 %v1356_v11, %v1243_v15  ;;  %v1436_v26 = vmul.f32 %v1372_v53, %v1243_v15  ;;  %v1375_v31 = vld [vmem:[%s3512_s7 + $0x40] sm:$0xff] }
 0x225   : >> { %v3567_v27 = vmov 0.0   ;;  %v1404_v63 = vmul.f32 %v1372_v53, %v1307_v60  ;;  %v1452_v28 = vmul.f32 %v1356_v11, %v1307_v60  ;;  %v2489_v29 = vpop.f32.mrb[24].mxu1  ;;  %v2525_v4 = vpop.f32.mrb[8].mxu0  ;;  %v1359_v60 = vld [vmem:[%s3511_s6 + $0x40] sm:$0xff] }
 0x226   : >> { %2533 = vmatprep.subr.bf16.mxu1 %v3567_v27  ;;  %2573 = vmatprep.subr.bf16.mxu0 %v3567_v27  ;;  %v1422_v5 = vsub.f32 %v1390_v6, %v1406_v3  ;;  %v1470_v2 = vadd.f32 %v1454_v7, %v1438_v39  ;;  %v1248_v58 = vsub.f32 %v3202_v38, %v2489_v29  ;;  %v1110_v0 = vpop.f32.mrb[25].mxu1  ;;  %v1320_v43 = vpop.f32.mrb[9].mxu0 }
 0x227   : >> { %v3283_v56 = vmul.f32 %v2525_v4, %v1377_v57  ;;  %2534 = vmatpush3.bf16.msra.mxu1 %v1480_v9  ;;  %v1420_v62 = vsub.f32 %v1388_v14, %v1404_v63  ;;  %v1468_v8 = vadd.f32 %v1452_v28, %v1436_v26  ;;  %v1457_v47 = vmul.f32 %v2525_v4, %v1361_v30  ;;  %v2490_v38 = vpop.f32.mrb[26].mxu1  ;;  %v2526_v3 = vpop.f32.mrb[10].mxu0 }
 0x228   : >> { %2574 = vmatpush3.bf16.msra.mxu0 %v1480_v9  ;;  %v1246_v12 = vsub.f32 %v3204_v33, %v1110_v0  ;;  %v1482_v7 = vpack.c.bf16 %v1422_v5, %v1421_v13  ;;  %v3292_v15 = vpack.c.bf16 %v1470_v2, %v1469_v52  ;;  %v1393_v11 = vmul.f32 %v1361_v30, %v1248_v58  ;;  %v1362_v9 = vld [vmem:[%s3511_s6 + $0x58] sm:$0xff]  ;;  %v1113_v6 = vpop.f32.mrb[27].mxu1  ;;  %v1323_v39 = vpop.f32.mrb[11].mxu0  ;;  %v1376_v30 = vld [vmem:[%s3512_s7 + $0x48] sm:$0xff]  ;;  %v1381_v0 = vld [vmem:[%s3512_s7 + $0x70] sm:$0xff] }
 0x229   : >> { %v1441_v53 = vmul.f32 %v1377_v57, %v1248_v58  ;;  %v1378_v33 = vld [vmem:[%s3512_s7 + $0x58] sm:$0xff]  ;;  %2535 = vmatprep.subr.bf16.mxu1 %v3567_v27  ;;  %v1481_v14 = vpack.c.bf16 %v1420_v62, %v1419_v42  ;;  %v3301_v26 = vpack.c.bf16 %v1468_v8, %v1467_v1  ;;  %v1360_v57 = vld [vmem:[%s3511_s6 + $0x48] sm:$0xff]  ;;  %2575 = vmatprep.subr.bf16.mxu0 %v3567_v27  ;;  %v1365_v58 = vld [vmem:[%s3511_s6 + $0x70] sm:$0xff] }
 0x22a   : >> { %v1391_v13 = vmul.f32 %v1359_v60, %v1246_v12  ;;  %v1439_v52 = vmul.f32 %v1375_v31, %v1246_v12  ;;  %v1425_v63 = vsub.f32 %v1393_v11, %v3283_v56  ;;  %v1407_v29 = vmul.f32 %v1375_v31, %v1320_v43 }
 0x22b   : >> { %v1473_v28 = vadd.f32 %v1457_v47, %v1441_v53  ;;  %v1455_v4 = vmul.f32 %v1359_v60, %v1320_v43  ;;  %v1249_v42 = vsub.f32 %v3206_v34, %v2490_v38  ;;  %v1410_v1 = vmul.f32 %v2526_v3, %v1378_v33  ;;  %2536 = vmatpush3.bf16.msra.mxu1 %v1481_v14  ;;  %v1379_v38 = vld [vmem:[%s3512_s7 + $0x60] sm:$0xff] }
 0x22c   : >> { %v1458_v5 = vmul.f32 %v2526_v3, %v1362_v9  ;;  %v1247_v2 = vsub.f32 %v3208_v35, %v1113_v6  ;;  %v1423_v62 = vsub.f32 %v1391_v13, %v1407_v29  ;;  %v1408_v8 = vmul.f32 %v1376_v30, %v1323_v39  ;;  %2576 = vmatpush3.bf16.msra.mxu0 %v1481_v14 }
 0x22d   : >> { %v1471_v56 = vadd.f32 %v1455_v4, %v1439_v52  ;;  %v1456_v47 = vmul.f32 %v1360_v57, %v1323_v39  ;;  %v1394_v43 = vmul.f32 %v1362_v9, %v1249_v42  ;;  %v1442_v34 = vmul.f32 %v1378_v33, %v1249_v42  ;;  %2537 = vmatprep.subr.bf16.mxu1 %v3567_v27  ;;  %v2493_v35 = vpop.f32.mrb[28].mxu1  ;;  %v2529_v31 = vpop.f32.mrb[12].mxu0 }
 0x22e   : >> { %v1392_v12 = vmul.f32 %v1360_v57, %v1247_v2  ;;  %v1440_v60 = vmul.f32 %v1376_v30, %v1247_v2  ;;  %2577 = vmatprep.subr.bf16.mxu0 %v3567_v27  ;;  %v1252_v3 = vsub.f32 %v3210_v37, %v2493_v35  ;;  %v1413_v11 = vmul.f32 %v2529_v31, %v1381_v0  ;;  %v1126_v6 = vpop.f32.mrb[29].mxu1  ;;  %v1336_v39 = vpop.f32.mrb[13].mxu0  ;;  %v1363_v37 = vld [vmem:[%s3511_s6 + $0x60] sm:$0xff] }
 0x22f   : >> { %v1461_v53 = vmul.f32 %v2529_v31, %v1365_v58  ;;  %v1426_v9 = vsub.f32 %v1394_v43, %v1410_v1  ;;  %v1474_v33 = vadd.f32 %v1458_v5, %v1442_v34  ;;  %2538 = vmatpush3.bf16.msra.mxu1 %v1482_v7  ;;  %v2494_v52 = vpop.f32.mrb[30].mxu1  ;;  %v2530_v57 = vpop.f32.mrb[14].mxu0  ;;  %v1250_v4 = vsub.f32 %v3212_v45, %v1126_v6  ;;  %v1382_v45 = vld [vmem:[%s3512_s7 + $0x78] sm:$0xff] }
 0x230   : >> { %v1424_v14 = vsub.f32 %v1392_v12, %v1408_v8  ;;  %v1472_v13 = vadd.f32 %v1456_v47, %v1440_v60  ;;  %v1397_v30 = vmul.f32 %v1365_v58, %v1252_v3  ;;  %v1445_v29 = vmul.f32 %v1381_v0, %v1252_v3  ;;  %2578 = vmatpush3.bf16.msra.mxu0 %v1482_v7  ;;  %v1129_v2 = vpop.f32.mrb[31].mxu1  ;;  %v1339_v35 = vpop.f32.mrb[15].mxu0  ;;  %v1366_v58 = vld [vmem:[%s3511_s6 + $0x78] sm:$0xff] }
 0x231   : >> { %v1411_v42 = vmul.f32 %v1379_v38, %v1336_v39  ;;  %v1484_v31 = vpack.c.bf16 %v1426_v9, %v1425_v63  ;;  %v3329_v1 = vpack.c.bf16 %v1474_v33, %v1473_v28  ;;  %2539 = vmatprep.subr.bf16.mxu1 %v3567_v27  ;;  %v1395_v47 = vmul.f32 %v1363_v37, %v1250_v4 }
 0x232   : >> { %v1483_v5 = vpack.c.bf16 %v1424_v14, %v1423_v62  ;;  %v3331_v8 = vpack.c.bf16 %v1472_v13, %v1471_v56  ;;  %v1429_v7 = vsub.f32 %v1397_v30, %v1413_v11  ;;  %v1477_v0 = vadd.f32 %v1461_v53, %v1445_v29  ;;  %2579 = vmatprep.subr.bf16.mxu0 %v3567_v27  ;;  %v1364_v62 = vld [vmem:[%s3511_s6 + $0x68] sm:$0xff] }
 0x233   : >> { %v1443_v43 = vmul.f32 %v1379_v38, %v1250_v4  ;;  %v1459_v63 = vmul.f32 %v1363_v37, %v1336_v39  ;;  %v1253_v28 = vsub.f32 %v3214_v51, %v2494_v52  ;;  %v1380_v56 = vld [vmem:[%s3512_s7 + $0x68] sm:$0xff]  ;;  %v1427_v34 = vsub.f32 %v1395_v47, %v1411_v42 }
 0x234   : >> { %2540 = vmatpush3.bf16.msra.mxu1 %v1483_v5  ;;  %v1414_v12 = vmul.f32 %v2530_v57, %v1382_v45  ;;  %v1462_v60 = vmul.f32 %v2530_v57, %v1366_v58  ;;  %v1251_v3 = vsub.f32 %v3216_v54, %v1129_v2  ;;  %2580 = vmatpush3.bf16.msra.mxu0 %v1483_v5  ;;  %v3568_v4 = vsub.bf16 0, %v3042_v50 }
 0x235   : >> { %v1475_v38 = vadd.f32 %v1459_v63, %v1443_v43  ;;  %v1398_v11 = vmul.f32 %v1366_v58, %v1253_v28  ;;  %v1446_v53 = vmul.f32 %v1382_v45, %v1253_v28  ;;  %2541 = vmatprep.subr.bf16.mxu1 %v3567_v27  ;;  %2581 = vmatprep.subr.bf16.mxu0 %v3567_v27  ;;  %v3569_v37 = vsub.bf16 0, %v3035_v49 }
 0x236   : >> { %v1396_v51 = vmul.f32 %v1364_v62, %v1251_v3  ;;  %v1444_v6 = vmul.f32 %v1380_v56, %v1251_v3  ;;  %v1412_v39 = vmul.f32 %v1380_v56, %v1339_v35  ;;  %v1460_v9 = vmul.f32 %v1364_v62, %v1339_v35 }
 0x237   : >> { %v1430_v33 = vsub.f32 %v1398_v11, %v1414_v12  ;;  %v1478_v14 = vadd.f32 %v1462_v60, %v1446_v53  ;;  %v2260_v42 = vcombine.low %v3569_v37, %v3568_v4  ;;  %v3571_v49 = vsub.bf16 (%p806_p4), 0, %v2930_v16  ;;  %v3582_v12 = vld [vmem:[#allocation20_spill] sm:$0xff] (%p806_p4) }
 0x238   : >> { %2542 = vmatpush3.bf16.msra.mxu1 %v1484_v31  ;;  %v1428_v13 = vsub.f32 %v1396_v51, %v1412_v39  ;;  %v1476_v52 = vadd.f32 %v1460_v9, %v1444_v6  ;;  %2582 = vmatpush3.bf16.msra.mxu0 %v1484_v31  ;;  %v3574_v16 = vsub.bf16 (%p806_p4), 0, %v2955_v21  ;;  %v3576_v28 = vsub.bf16 (%p806_p4), 0, %v2965_v23  ;;  %v3588_v51 = vld [vmem:[#allocation25_spill] sm:$0xff] (%p806_p4)  ;;  %v3590_v39 = vld [vmem:[#allocation24_spill] sm:$0xff] (%p806_p4) }
 0x239   : >> { %2543 = vmatprep.subr.bf16.mxu1 %v3567_v27  ;;  %v1486_v54 = vpack.c.bf16 %v1430_v33, %v1429_v7  ;;  %v1494_v57 = vpack.c.bf16 %v1478_v14, %v1477_v0  ;;  %2583 = vmatprep.subr.bf16.mxu0 %v3567_v27  ;;  %v3577_v62 = vsub.bf16 (%p806_p4), 0, %v2960_v22  ;;  %v3579_v21 = vsub.bf16 (%p806_p4), 0, %v2970_v24  ;;  %v3580_v22 = vld [vmem:[#allocation21_spill] sm:$0xff] (%p806_p4) }
 0x23a   : >> { %v1485_v30 = vpack.c.bf16 %v1428_v13, %v1427_v34  ;;  %v1493_v29 = vpack.c.bf16 %v1476_v52, %v1475_v38  ;;  %v3581_v23 = vsub.bf16 (%p806_p4), 0, %v3580_v22  ;;  %v3583_v60 = vsub.bf16 (%p806_p4), 0, %v3582_v12  ;;  %v3586_v38 = vld [vmem:[#allocation22_spill] sm:$0xff] (%p806_p4) }
 0x23b   : > { %v2272_v56 = vcombine.low (%p806_p4), %v3577_v62, %v3576_v28  ;;  %v3587_v11 = vsub.bf16 (%p806_p4), 0, %v3586_v38  ;;  %v3589_v6 = vsub.bf16 (%p806_p4), 0, %v3588_v51  ;;  %v3591_v9 = vsub.bf16 (%p806_p4), 0, %v3590_v39 }
 0x23c   : >> { %2544 = vmatpush3.bf16.msra.mxu1 %v1485_v30  ;;  %2584 = vmatpush3.bf16.msra.mxu0 %v1485_v30  ;;  %v2274_v3 = vcombine.low (%p806_p4), %v3583_v60, %v3581_v23 }
 0x23d   : >> { %2545 = vmatprep.subr.bf16.mxu1 %v3567_v27  ;;  %2585 = vmatprep.subr.bf16.mxu0 %v3567_v27  ;;  %v2276_v33 = vcombine.low (%p806_p4), %v3591_v9, %v3589_v6 }
 0x240   : >> { %2546 = vmatpush3.bf16.msra.mxu1 %v1486_v54  ;;  %2586 = vmatpush3.bf16.msra.mxu0 %v1486_v54 }
 0x241   : >> { %2551 = vmatprep.subr.bf16.mxu1 %v3567_v27  ;;  %2591 = vmatprep.subr.bf16.mxu0 %v3567_v27 }
 0x243   : >> { %2548 = vmatmul.mubr.bf16.vlgmr.msra.gmra.mrb[32].mxu1 %v3018_v40  ;;  %2588 = vmatmul.mubr.bf16.vlgmr.msra.gmra.mrb[16].mxu0 %v2260_v42 }
 0x244   : >> { %2552 = vmatpush3.bf16.msra.mxu1 %v3264_v41  ;;  %2592 = vmatpush3.bf16.msra.mxu0 %v3264_v41 }
 0x245   : >> { %2553 = vmatprep.subr.bf16.mxu1 %v3567_v27  ;;  %2593 = vmatprep.subr.bf16.mxu0 %v3567_v27 }
 0x246   : >> { %2567 = vmatprep.mubr.msk.bf16.mxu1 %vm2788_vm1, %v3567_v27  ;;  %2607 = vmatprep.mubr.msk.bf16.mxu0 %vm2788_vm1, %v3567_v27 }
 0x248   : >> { %2554 = vmatpush3.bf16.msra.mxu1 %v3254_v10  ;;  %2594 = vmatpush3.bf16.msra.mxu0 %v3254_v10 }
 0x249   : >> { %2555 = vmatprep.subr.bf16.mxu1 %v3567_v27  ;;  %2595 = vmatprep.subr.bf16.mxu0 %v3567_v27 }
 0x24c   : >> { %2556 = vmatpush3.bf16.msra.mxu1 %v3301_v26  ;;  %2596 = vmatpush3.bf16.msra.mxu0 %v3301_v26 }
 0x24d   : >> { %2557 = vmatprep.subr.bf16.mxu1 %v3567_v27  ;;  %2597 = vmatprep.subr.bf16.mxu0 %v3567_v27 }
 0x250   : >> { %2558 = vmatpush3.bf16.msra.mxu1 %v3292_v15  ;;  %2598 = vmatpush3.bf16.msra.mxu0 %v3292_v15 }
 0x251   : >> { %2559 = vmatprep.subr.bf16.mxu1 %v3567_v27  ;;  %2599 = vmatprep.subr.bf16.mxu0 %v3567_v27 }
 0x254   : >> { %2560 = vmatpush3.bf16.msra.mxu1 %v3331_v8  ;;  %2600 = vmatpush3.bf16.msra.mxu0 %v3331_v8 }
 0x255   : >> { %2561 = vmatprep.subr.bf16.mxu1 %v3567_v27  ;;  %2601 = vmatprep.subr.bf16.mxu0 %v3567_v27 }
 0x258   : >> { %2562 = vmatpush3.bf16.msra.mxu1 %v3329_v1  ;;  %2602 = vmatpush3.bf16.msra.mxu0 %v3329_v1 }
 0x259   : >> { %2563 = vmatprep.subr.bf16.mxu1 %v3567_v27  ;;  %2603 = vmatprep.subr.bf16.mxu0 %v3567_v27 }
 0x25c   : >> { %2564 = vmatpush3.bf16.msra.mxu1 %v1493_v29  ;;  %2604 = vmatpush3.bf16.msra.mxu0 %v1493_v29 }
 0x25d   : >> { %2565 = vmatprep.subr.bf16.mxu1 %v3567_v27  ;;  %2605 = vmatprep.subr.bf16.mxu0 %v3567_v27 }
 0x260   : >> { %2566 = vmatpush3.bf16.msra.mxu1 %v1494_v57  ;;  %2606 = vmatpush3.bf16.msra.mxu0 %v1494_v57 }
 0x261   : > { %2611 = vmatprep.subr.bf16.mxu1 (%p806_p4), %v3087_v32  ;;  %2659 = vmatprep.subr.bf16.mxu0 (%p806_p4), %v3087_v32 }
 0x263   : >> { %2568 = vmatmul.mubr.bf16.vlgmr.msra.gmra.mrb[36].mxu1 %v2260_v42  ;;  %2608 = vmatmul.mubr.bf16.vlgmr.msra.gmra.mrb[16].mxu0 %v3018_v40  ;;  %v3570_v40 = vsub.bf16 (%p806_p4), 0, %v2935_v17 }
 0x264   : > { %2612 = vmatpush3.bf16.msra.mxu1 (%p806_p4), %v3087_v32  ;;  %2660 = vmatpush3.bf16.msra.mxu0 (%p806_p4), %v3087_v32 }
 0x265   : > { %2613 = vmatprep.subr.bf16.mxu1 (%p806_p4), %v3103_v36  ;;  %2661 = vmatprep.subr.bf16.mxu0 (%p806_p4), %v3103_v36  ;;  %v2269_v50 = vcombine.low (%p806_p4), %v3571_v49, %v3570_v40 }
 0x268   : > { %2614 = vmatpush3.bf16.msra.mxu1 (%p806_p4), %v3103_v36  ;;  %2662 = vmatpush3.bf16.msra.mxu0 (%p806_p4), %v3103_v36 }
 0x269   : > { %2615 = vmatprep.subr.bf16.mxu1 (%p806_p4), %v3109_v44  ;;  %2663 = vmatprep.subr.bf16.mxu0 (%p806_p4), %v3109_v44 }
 0x26c   : > { %2616 = vmatpush3.bf16.msra.mxu1 (%p806_p4), %v3109_v44  ;;  %2664 = vmatpush3.bf16.msra.mxu0 (%p806_p4), %v3109_v44  ;;  %v3572_v44 = vsub.bf16 (%p806_p4), 0, %v2945_v19 }
 0x26d   : > { %2617 = vmatprep.subr.bf16.mxu1 (%p806_p4), %v3121_v48  ;;  %2665 = vmatprep.subr.bf16.mxu0 (%p806_p4), %v3121_v48 }
 0x270   : > { %2618 = vmatpush3.bf16.msra.mxu1 (%p806_p4), %v3121_v48  ;;  %2666 = vmatpush3.bf16.msra.mxu0 (%p806_p4), %v3121_v48  ;;  %v3573_v48 = vsub.bf16 (%p806_p4), 0, %v2940_v18 }
 0x271   : > { %2619 = vmatprep.subr.bf16.mxu1 (%p806_p4), %v3127_v55  ;;  %2667 = vmatprep.subr.bf16.mxu0 (%p806_p4), %v3127_v55 }
 0x274   : > { %2620 = vmatpush3.bf16.msra.mxu1 (%p806_p4), %v3127_v55  ;;  %2668 = vmatpush3.bf16.msra.mxu0 (%p806_p4), %v3127_v55  ;;  %v2270_v55 = vcombine.low (%p806_p4), %v3573_v48, %v3572_v44 }
 0x275   : > { %2621 = vmatprep.subr.bf16.mxu1 (%p806_p4), %v3139_v59  ;;  %2669 = vmatprep.subr.bf16.mxu0 (%p806_p4), %v3139_v59 }
 0x278   : > { %2622 = vmatpush3.bf16.msra.mxu1 (%p806_p4), %v3139_v59  ;;  %2670 = vmatpush3.bf16.msra.mxu0 (%p806_p4), %v3139_v59 }
 0x279   : > { %2623 = vmatprep.subr.bf16.mxu1 (%p806_p4), %v3145_v61  ;;  %2671 = vmatprep.subr.bf16.mxu0 (%p806_p4), %v3145_v61 }
 0x27c   : > { %2624 = vmatpush3.bf16.msra.mxu1 (%p806_p4), %v3145_v61  ;;  %2672 = vmatpush3.bf16.msra.mxu0 (%p806_p4), %v3145_v61  ;;  %v3575_v61 = vsub.bf16 (%p806_p4), 0, %v2950_v20  ;;  %v3578_v20 = vsub.bf16 (%p806_p4), 0, %v2975_v25  ;;  %v3584_v25 = vld [vmem:[#allocation23_spill] sm:$0xff] (%p806_p4) }
 0x27d   : > { %2625 = vmatprep.subr.bf16.mxu1 (%p806_p4), %v3157_v46  ;;  %2673 = vmatprep.subr.bf16.mxu0 (%p806_p4), %v3157_v46  ;;  %v3585_v24 = vsub.bf16 (%p806_p4), 0, %v3584_v25 }
 0x27e   : > { %v2273_v34 = vcombine.low (%p806_p4), %v3579_v21, %v3578_v20 }
 0x27f   : > { %v2275_v53 = vcombine.low (%p806_p4), %v3587_v11, %v3585_v24 }
 0x280   : > { %2626 = vmatpush3.bf16.msra.mxu1 (%p806_p4), %v3157_v46  ;;  %2674 = vmatpush3.bf16.msra.mxu0 (%p806_p4), %v3157_v46  ;;  %v2271_v46 = vcombine.low (%p806_p4), %v3575_v61, %v3574_v16 }
 0x281   : > { %2635 = vmatprep.subr.bf16.mxu1 (%p806_p4), %v2269_v50  ;;  %2683 = vmatprep.subr.bf16.mxu0 (%p806_p4), %v2269_v50 }
 0x316   : >> { %v1529_v10 = vpop.f32.mrb[32].mxu1 }
 0x317   : >> { %v2549_v41 = vpop.f32.mrb[33].mxu1 }
 0x318   : >> { %v1532_v15 = vpop.f32.mrb[34].mxu1 }
 0x319   : >> { %v2550_v26 = vpop.f32.mrb[35].mxu1 }
 0x336   : >> { %v1576_v2 = vpop.f32.mrb[36].mxu1  ;;  %v1660_v35 = vpop.f32.mrb[16].mxu0 }
 0x337   : >> { %v1624_v31 = vsub.f32 %v1529_v10, %v1576_v2  ;;  %v2569_v1 = vpop.f32.mrb[37].mxu1  ;;  %v2609_v5 = vpop.f32.mrb[17].mxu0  ;;  %808 = sbr.rel (!%p806_p4) target bundleno = 279 (0x117), region = 106 }
 0x338   : >> { %v1579_v8 = vpop.f32.mrb[38].mxu1  ;;  %v1663_v58 = vpop.f32.mrb[18].mxu0 }
 0x339   : >> { %v1625_v45 = vsub.f32 %v1532_v15, %v1579_v8  ;;  %v1669_v27 = vpack.c.bf16 %v1663_v58, %v1660_v35  ;;  %v2570_v7 = vpop.f32.mrb[39].mxu1  ;;  %v2610_v0 = vpop.f32.mrb[19].mxu0 }
 0x33b   : >> { %v1667_v47 = vpack.c.bf16 %v1625_v45, %v1624_v31  ;;  %1670 = vst [vmem:[%s3098_s23] sm:$0xff] %v1669_v27 }
 0x33d   : >> { %1668 = vst [vmem:[%s3095_s22] sm:$0xff] %v1667_v47 }
 0x342   : > { %v3402_v63 = vld [vmem:[#allocation3] sm:$0xff]  ;;  %v1676_v36 = vld [vmem:[#allocation3 + $0x8] sm:$0xff]  ;;  %v1677_v17 = vld [vmem:[#allocation3 + $0x10] sm:$0xff] }
 0x343   : > { %2675 = vmatprep.mubr.bf16.mxu0 %v3402_v63  ;;  %v1678_v18 = vld [vmem:[#allocation3 + $0x18] sm:$0xff] }
 0x344   : > { %v3400_v43 = vld [vmem:[#allocation2] sm:$0xff]  ;;  %v1672_v32 = vld [vmem:[#allocation2 + $0x8] sm:$0xff]  ;;  %2676 = vmatmul.mubr.bf16.vlgmr.msra.gmra.mrb[0].mxu0 %v1676_v36  ;;  %v1673_v59 = vld [vmem:[#allocation2 + $0x10] sm:$0xff] }
 0x345   : > { %2627 = vmatprep.mubr.bf16.mxu1 %v3400_v43  ;;  %2684 = vmatpush3.bf16.msra.mxu0 %v2269_v50  ;;  %v1674_v19 = vld [vmem:[#allocation2 + $0x18] sm:$0xff] }
 0x346   : > { %2628 = vmatmul.mubr.bf16.vlgmr.msra.gmra.mrb[0].mxu1 %v1672_v32  ;;  %2685 = vmatprep.subr.bf16.mxu0 %v2270_v55 }
 0x347   : > { %2636 = vmatpush3.bf16.msra.mxu1 %v2269_v50  ;;  %2631 = vmatprep.mubr.bf16.mxu1 %v1673_v59 }
 0x348   : > { %2637 = vmatprep.subr.bf16.mxu1 %v2270_v55  ;;  %2679 = vmatprep.mubr.bf16.mxu0 %v1677_v17 }
 0x349   : > { %2686 = vmatpush3.bf16.msra.mxu0 %v2270_v55 }
 0x34a   : > { %2687 = vmatprep.subr.bf16.mxu0 %v2271_v46 }
 0x34b   : > { %2638 = vmatpush3.bf16.msra.mxu1 %v2270_v55 }
 0x34c   : > { %2639 = vmatprep.subr.bf16.mxu1 %v2271_v46  ;;  %2680 = vmatmul.mubr.bf16.gmra.mrb[4].mxu0 %v1678_v18 }
 0x34d   : > { %2688 = vmatpush3.bf16.msra.mxu0 %v2271_v46  ;;  %2699 = vmatprep.mubr.bf16.mxu0 %v3400_v43 }
 0x34e   : > { %2632 = vmatmul.mubr.bf16.gmra.mrb[4].mxu1 %v1674_v19  ;;  %2689 = vmatprep.subr.bf16.mxu0 %v2272_v56 }
 0x34f   : > { %2640 = vmatpush3.bf16.msra.mxu1 %v2271_v46  ;;  %2651 = vmatprep.mubr.bf16.mxu1 %v3402_v63 }
 0x350   : > { %2641 = vmatprep.subr.bf16.mxu1 %v2272_v56 }
 0x351   : > { %2690 = vmatpush3.bf16.msra.mxu0 %v2272_v56 }
 0x352   : > { %2691 = vmatprep.subr.bf16.mxu0 %v2273_v34 }
 0x353   : > { %2642 = vmatpush3.bf16.msra.mxu1 %v2272_v56 }
 0x354   : > { %2643 = vmatprep.subr.bf16.mxu1 %v2273_v34 }
 0x355   : > { %2692 = vmatpush3.bf16.msra.mxu0 %v2273_v34 }
 0x356   : > { %2693 = vmatprep.subr.bf16.mxu0 %v2274_v3 }
 0x357   : > { %2644 = vmatpush3.bf16.msra.mxu1 %v2273_v34 }
 0x358   : > { %2645 = vmatprep.subr.bf16.mxu1 %v2274_v3 }
 0x359   : > { %2694 = vmatpush3.bf16.msra.mxu0 %v2274_v3 }
 0x35a   : > { %2695 = vmatprep.subr.bf16.mxu0 %v2275_v53 }
 0x35b   : > { %2646 = vmatpush3.bf16.msra.mxu1 %v2274_v3 }
 0x35c   : > { %2647 = vmatprep.subr.bf16.mxu1 %v2275_v53 }
 0x35d   : > { %2696 = vmatpush3.bf16.msra.mxu0 %v2275_v53 }
 0x35e   : > { %2697 = vmatprep.subr.bf16.mxu0 %v2276_v33 }
 0x35f   : > { %2648 = vmatpush3.bf16.msra.mxu1 %v2275_v53 }
 0x360   : > { %2649 = vmatprep.subr.bf16.mxu1 %v2276_v33 }
 0x361   : > { %2698 = vmatpush3.bf16.msra.mxu0 %v2276_v33 }
 0x363   : > { %2650 = vmatpush3.bf16.msra.mxu1 %v2276_v33 }
 0x364   : > { %2700 = vmatmul.mubr.bf16.vlgmr.msra.gmra.mrb[0].mxu0 %v1672_v32 }
 0x365   : > { %2703 = vmatprep.mubr.bf16.mxu0 %v1673_v59 }
 0x366   : > { %2652 = vmatmul.mubr.bf16.vlgmr.msra.gmra.mrb[8].mxu1 %v1676_v36 }
 0x367   : > { %2655 = vmatprep.mubr.bf16.mxu1 %v1677_v17 }
 0x36c   : > { %2704 = vmatmul.mubr.bf16.gmra.mrb[4].mxu0 %v1674_v19 }
 0x36e   : > { %2656 = vmatmul.mubr.bf16.gmra.mrb[12].mxu1 %v1678_v18 }
 0x419   : > { %v2629_v14 = vpop.f32.mrb[0].mxu1 }
 0x41a   : > { %v1761_v13 = vpop.f32.mrb[1].mxu1 }
 0x41b   : > { %v2630_v52 = vpop.f32.mrb[2].mxu1 }
 0x41c   : > { %v1764_v54 = vpop.f32.mrb[3].mxu1 }
 0x421   : > { %v2633_v57 = vpop.f32.mrb[4].mxu1 }
 0x422   : > { %v1777_v30 = vpop.f32.mrb[5].mxu1 }
 0x423   : > { %v2634_v29 = vpop.f32.mrb[6].mxu1 }
 0x424   : > { %v1780_v4 = vpop.f32.mrb[7].mxu1 }
 0x437   : > { %v2701_v42 = vpop.f32.mrb[0].mxu0 }
 0x438   : > { %2053 = vst.msk [vmem:[%s3059_s15 + $0x10] sm:$0xff] %vm469_vm0, %v2701_v42  ;;  %v2012_v15 = vpop.f32.mrb[1].mxu0 }
 0x439   : > { %v2653_v37 = vpop.f32.mrb[8].mxu1  ;;  %2051 = vst.msk [vmem:[%s3059_s15] sm:$0xff] %vm469_vm0, %v2012_v15  ;;  %v2702_v35 = vpop.f32.mrb[2].mxu0 }
 0x43a   : > { %v1972_v10 = vsub.f32 %v2629_v14, %v2653_v37  ;;  %v1874_v41 = vpop.f32.mrb[9].mxu1  ;;  %2054 = vst.msk [vmem:[%s3059_s15 + $0x18] sm:$0xff] %vm469_vm0, %v2702_v35  ;;  %v2015_v5 = vpop.f32.mrb[3].mxu0 }
 0x43b   : > { %v1970_v26 = vsub.f32 %v1761_v13, %v1874_v41  ;;  %v2654_v2 = vpop.f32.mrb[10].mxu1  ;;  %2052 = vst.msk [vmem:[%s3059_s15 + $0x8] sm:$0xff] %vm469_vm0, %v2015_v5 }
 0x43c   : > { %2045 = vst.msk [vmem:[%s3054_s12 + $0x10] sm:$0xff] %vm469_vm0, %v1972_v10  ;;  %v1973_v31 = vsub.f32 %v2630_v52, %v2654_v2  ;;  %v1877_v1 = vpop.f32.mrb[11].mxu1 }
 0x43d   : > { %2043 = vst.msk [vmem:[%s3054_s12] sm:$0xff] %vm469_vm0, %v1970_v26  ;;  %v1971_v8 = vsub.f32 %v1764_v54, %v1877_v1 }
 0x43e   : > { %2046 = vst.msk [vmem:[%s3054_s12 + $0x18] sm:$0xff] %vm469_vm0, %v1973_v31 }
 0x43f   : > { %2044 = vst.msk [vmem:[%s3054_s12 + $0x8] sm:$0xff] %vm469_vm0, %v1971_v8  ;;  %v2705_v45 = vpop.f32.mrb[4].mxu0 }
 0x440   : > { %2057 = vst.msk [vmem:[%s3059_s15 + $0x30] sm:$0xff] %vm469_vm0, %v2705_v45  ;;  %v2028_v0 = vpop.f32.mrb[5].mxu0 }
 0x441   : > { %v2657_v58 = vpop.f32.mrb[12].mxu1  ;;  %2055 = vst.msk [vmem:[%s3059_s15 + $0x20] sm:$0xff] %vm469_vm0, %v2028_v0  ;;  %v2706_v63 = vpop.f32.mrb[6].mxu0 }
 0x442   : > { %v1976_v27 = vsub.f32 %v2633_v57, %v2657_v58  ;;  %v1890_v7 = vpop.f32.mrb[13].mxu1  ;;  %2058 = vst.msk [vmem:[%s3059_s15 + $0x38] sm:$0xff] %vm469_vm0, %v2706_v63  ;;  %v2031_v50 = vpop.f32.mrb[7].mxu0 }
 0x443   : > { %v1974_v47 = vsub.f32 %v1777_v30, %v1890_v7  ;;  %v2658_v43 = vpop.f32.mrb[14].mxu1  ;;  %2056 = vst.msk [vmem:[%s3059_s15 + $0x28] sm:$0xff] %vm469_vm0, %v2031_v50 }
 0x444   : > { %2049 = vst.msk [vmem:[%s3054_s12 + $0x30] sm:$0xff] %vm469_vm0, %v1976_v27  ;;  %v1977_v40 = vsub.f32 %v2634_v29, %v2658_v43  ;;  %v1893_v49 = vpop.f32.mrb[15].mxu1 }
 0x445   : > { %2047 = vst.msk [vmem:[%s3054_s12 + $0x20] sm:$0xff] %vm469_vm0, %v1974_v47  ;;  %v1975_v32 = vsub.f32 %v1780_v4, %v1893_v49 }
 0x446   : > { %2050 = vst.msk [vmem:[%s3054_s12 + $0x38] sm:$0xff] %vm469_vm0, %v1977_v40 }
 0x447   : > { %2048 = vst.msk [vmem:[%s3054_s12 + $0x28] sm:$0xff] %vm469_vm0, %v1975_v32 }
 0x448 PF: > { %s20_s30 = sadd.s32 1, %s2781_s30  }
 0x449   : > { %p17_p5 = scmp.ge.s32.totalorder %s20_s30, 4  }
 0x44b   :  { %19 = sbr.rel (!%p17_p5) target bundleno = 1 (0x1), region = 117 }

</bundles_post_ra>
